<compile_context>
chip_gen: v7x
topology: tpu7x:2x2x1
jax: 0.10.0
libtpu: 0.0.40
codegen_flags: <defaults>
</compile_context>

<pallas_src>
import functools

import jax
import jax.numpy as jnp
from jax.experimental import pallas as pl
from jax.experimental.pallas import tpu as pltpu


# ----------------------------- kernel ---------------------------------------


def _layer_norm(x, gamma, beta, eps=1e-5):
    mean = jnp.mean(x, axis=-1, keepdims=True)
    var = jnp.mean((x - mean) ** 2, axis=-1, keepdims=True)
    return (x - mean) * jax.lax.rsqrt(var + eps) * gamma + beta


def _bst_kernel(TB, S, H, nh,
                x_ref, tgt_ref,
                wqkv_ref, bqkv_ref, wo_ref, bo_ref, g1_ref, be1_ref,
                w1_ref, b1_ref, w2_ref, b2_ref, g2_ref, be2_ref,
                pw1_ref, pb1_ref, pw2_ref, pb2_ref,
                attn_ref, pred_ref,
                x_sc, ao_sc):
    """One grid step = one transformer layer applied to one batch tile."""
    l = pl.program_id(1)
    hd = H // nh
    scale = 1.0 / (hd ** 0.5)

    # Load the embedded sequence into the carried activation at layer 0.
    @pl.when(l == 0)
    def _():
        x_sc[...] = x_ref[...]

    x = x_sc[...]                                            # (TB*S, H)

    # Fused QKV projection: one MXU pass with 3x wider N.
    qkv = (jnp.dot(x, wqkv_ref[...], preferred_element_type=jnp.float32)
           + bqkv_ref[...])                                  # (TB*S, 3H)
    q3 = qkv[:, 0 * H:1 * H].reshape(TB, S, H)
    k3 = qkv[:, 1 * H:2 * H].reshape(TB, S, H)
    v3 = qkv[:, 2 * H:3 * H].reshape(TB, S, H)

    # Batched (over the batch tile) attention; small static loop over heads.
    for h in range(nh):
        qh = q3[:, :, h * hd:(h + 1) * hd]                   # (TB, S, hd)
        kh = k3[:, :, h * hd:(h + 1) * hd]
        vh = v3[:, :, h * hd:(h + 1) * hd]
        s = jnp.einsum('bqd,bkd->bqk', qh, kh,
                       preferred_element_type=jnp.float32) * scale
        s = s - jnp.max(s, axis=-1, keepdims=True)
        p = jnp.exp(s)
        p = p * pl.reciprocal(jnp.sum(p, axis=-1, keepdims=True), approx=True)
        attn_ref[h] = p                                      # (TB, S, S)
        oh = jnp.einsum('bqk,bkd->bqd', p, vh,
                        preferred_element_type=jnp.float32)  # (TB, S, hd)
        ao_sc[:, h * hd:(h + 1) * hd] = oh.reshape(TB * S, hd)

    attn_out = (jnp.dot(ao_sc[...], wo_ref[...],
                        preferred_element_type=jnp.float32) + bo_ref[...])
    # TODO(synk): dropout layers are identity here (eval-mode semantics).
    x = _layer_norm(x + attn_out, g1_ref[...], be1_ref[...])

    hidden = jnp.maximum(
        jnp.dot(x, w1_ref[...], preferred_element_type=jnp.float32)
        + b1_ref[...], 0.0)
    ff = (jnp.dot(hidden, w2_ref[...], preferred_element_type=jnp.float32)
          + b2_ref[...])
    x = _layer_norm(x + ff, g2_ref[...], be2_ref[...])
    x_sc[...] = x

    # Fused prediction-MLP epilogue after the last layer.
    @pl.when(l == pl.num_programs(1) - 1)
    def _():
        seq_rep = x.reshape(TB, S, H)[:, S - 1, :]           # (TB, H)
        tr = tgt_ref[...]                                    # (TB, 2H)
        # combined = [seq_rep | target_rep]; split the matmul instead of concat.
        h1 = (jnp.dot(seq_rep, pw1_ref[0:H, :],
                      preferred_element_type=jnp.float32)
              + jnp.dot(tr, pw1_ref[H:3 * H, :],
                        preferred_element_type=jnp.float32)
              + pb1_ref[...])
        h1 = jnp.maximum(h1, 0.0)
        logit = (jnp.dot(h1, pw2_ref[...],
                         preferred_element_type=jnp.float32) + pb2_ref[...])
        pred_ref[...] = 1.0 / (1.0 + jnp.exp(-logit))        # (TB, 1)


# ----------------------------- wrappers -------------------------------------


def _pick_batch_tile(B, S):
    # Prefer 2 batch tiles (one per TensorCore on megacore parts) as long as
    # the row block stays (8,128)-legal; otherwise keep the batch in one tile.
    if B % 2 == 0 and ((B // 2) * S) % 8 == 0:
        return B // 2
    return B


def run_bst_stack(x2d, target_rep, params, B, S, H, nh, L):
    TB = _pick_batch_tile(B, S)
    n_bt = B // TB

    # Fuse Q/K/V weights (wrapper-side, once).
    wqkv = jnp.concatenate([params['wq'], params['wk'], params['wv']], axis=-1)
    bqkv = jnp.concatenate([params['bq'], params['bk'], params['bv']], axis=-1)
    tgt3 = target_rep.reshape(n_bt, TB, 2 * H)

    kernel = functools.partial(_bst_kernel, TB, S, H, nh)

    def lspec(shape):
        # per-layer streamed block: leading L dim squeezed, rest full.
        nd = len(shape) - 1
        return pl.BlockSpec((None,) + tuple(shape[1:]),
                            lambda b, l, _nd=nd: (l,) + (0,) * _nd)

    def cspec(shape):
        # whole array resident in VMEM, constant block index (fetched once).
        nd = len(shape)
        return pl.BlockSpec(tuple(shape), lambda b, l, _nd=nd: (0,) * _nd)

    in_specs = [
        pl.BlockSpec((TB * S, H), lambda b, l: (b, 0)),            # x2d
        pl.BlockSpec((None, TB, 2 * H), lambda b, l: (b, 0, 0)),   # target_rep
        lspec(wqkv.shape), lspec(bqkv.shape),
        lspec(params['wo'].shape), lspec(params['bo'].shape),
        lspec(params['g1'].shape), lspec(params['be1'].shape),
        lspec(params['w1'].shape), lspec(params['b1'].shape),
        lspec(params['w2'].shape), lspec(params['b2'].shape),
        lspec(params['g2'].shape), lspec(params['be2'].shape),
        cspec(params['pw1'].shape), cspec(params['pb1'].shape),
        cspec(params['pw2'].shape), cspec(params['pb2'].shape),
    ]
    out_shape = (jax.ShapeDtypeStruct((L, nh, B, S, S), jnp.float32),
                 jax.ShapeDtypeStruct((n_bt, TB, 1), jnp.float32))
    out_specs = (
        pl.BlockSpec((None, nh, TB, S, S), lambda b, l: (l, 0, b, 0, 0)),
        pl.BlockSpec((None, TB, 1), lambda b, l: (b, 0, 0)),
    )

    attn, pred = pl.pallas_call(
        kernel,
        grid=(n_bt, L),
        out_shape=out_shape,
        in_specs=in_specs,
        out_specs=out_specs,
        scratch_shapes=[pltpu.VMEM((TB * S, H), jnp.float32),   # carried x
                        pltpu.VMEM((TB * S, H), jnp.float32)],  # attn-out slab
        compiler_params=pltpu.CompilerParams(
            dimension_semantics=("parallel", "arbitrary")),
    )(x2d, tgt3, wqkv, bqkv,
      params['wo'], params['bo'], params['g1'], params['be1'],
      params['w1'], params['b1'], params['w2'], params['b2'],
      params['g2'], params['be2'],
      params['pw1'], params['pb1'], params['pw2'], params['pb2'])

    attn = jnp.transpose(attn, (0, 2, 1, 3, 4))   # (L, B, nh, S, S)
    pred = pred.reshape(B, 1)
    return pred, attn


def bst_forward(params, seq_items, target_item, target_features, nh):
    B, S = seq_items.shape
    H = params['item_emb'].shape[1]
    L = params['wq'].shape[0]

    # --- embedding glue (plain JAX) ---
    seq_emb = params['item_emb'][seq_items] + params['pos_emb'][:S][None, :, :]
    x2d = seq_emb.reshape(B * S, H).astype(jnp.float32)

    tgt_item_emb = params['item_emb'][target_item]
    # TODO(synk): reference FeatureEmbedding indexes x[:, :, i] which assumes a
    # 3-D input; target_features here is 2-D (B, num_features) per the BST
    # forward docstring, so field i is embedded from target_features[:, i].
    tgt_feat_emb = jnp.concatenate(
        [tbl[target_features[:, i]] for i, tbl in enumerate(params['feat_emb'])],
        axis=-1)
    target_rep = jnp.concatenate([tgt_item_emb, tgt_feat_emb],
                                 axis=-1).astype(jnp.float32)   # (B, 2H)

    # TODO(synk): the PyTorch pred_layer is declared Linear(hidden_dim*2, ...)
    # but the forward concat produces 3*hidden_dim; sized 3H to match the
    # forward's actual data flow.
    pred, attn = run_bst_stack(x2d, target_rep, params, B, S, H, nh, L)
    return pred, [attn[l] for l in range(L)]


# --------------------------- pure-JAX reference ------------------------------


def reference_forward(params, seq_items, target_item, target_features, nh):
    B, S = seq_items.shape
    H = params['item_emb'].shape[1]
    L = params['wq'].shape[0]
    hd = H // nh
    scale = 1.0 / (hd ** 0.5)

    seq_emb = params['item_emb'][seq_items] + params['pos_emb'][:S][None, :, :]
    x = seq_emb.reshape(B * S, H).astype(jnp.float32)
    attn_all = []
    for l in range(L):
        q = x @ params['wq'][l] + params['bq'][l]
        k = x @ params['wk'][l] + params['bk'][l]
        v = x @ params['wv'][l] + params['bv'][l]
        q = q.reshape(B, S, nh, hd).transpose(0, 2, 1, 3)
        k = k.reshape(B, S, nh, hd).transpose(0, 2, 1, 3)
        v = v.reshape(B, S, nh, hd).transpose(0, 2, 1, 3)
        scores = jnp.einsum('bhqd,bhkd->bhqk', q, k) * scale
        p = jax.nn.softmax(scores, axis=-1)
        attn_all.append(p)
        o = jnp.einsum('bhqk,bhkd->bhqd', p, v).transpose(0, 2, 1, 3)
        o = o.reshape(B * S, H) @ params['wo'][l] + params['bo'][l]
        x = _layer_norm(x + o, params['g1'][l], params['be1'][l])
        h = jnp.maximum(x @ params['w1'][l] + params['b1'][l], 0.0)
        ff = h @ params['w2'][l] + params['b2'][l]
        x = _layer_norm(x + ff, params['g2'][l], params['be2'][l])
    seq_rep = x.reshape(B, S, H)[:, -1, :]
    tgt_item_emb = params['item_emb'][target_item]
    tgt_feat_emb = jnp.concatenate(
        [tbl[target_features[:, i]] for i, tbl in enumerate(params['feat_emb'])],
        axis=-1)
    combined = jnp.concatenate([seq_rep, tgt_item_emb, tgt_feat_emb], axis=1)
    h = jnp.maximum(combined @ params['pw1'] + params['pb1'], 0.0)
    pred = 1.0 / (1.0 + jnp.exp(-(h @ params['pw2'] + params['pb2'])))
    return pred, attn_all


# ------------------------------- params --------------------------------------


def init_params(key, item_vocab, field_dims, max_seq_len, H, L, F):
    nf = len(field_dims)
    fe_dim = H // nf
    keys = iter(jax.random.split(key, 64))

    def rnd(shape, scale=0.05):
        return (jax.random.normal(next(keys), shape) * scale).astype(jnp.float32)

    params = {}
    params['item_emb'] = rnd((item_vocab, H)).at[0].set(0.0)   # padding_idx=0
    params['pos_emb'] = rnd((max_seq_len, H))
    params['feat_emb'] = [rnd((d, fe_dim)).at[0].set(0.0) for d in field_dims]

    def stacked(shape):
        return rnd((L,) + shape)

    params['wq'] = stacked((H, H)); params['bq'] = stacked((1, H))
    params['wk'] = stacked((H, H)); params['bk'] = stacked((1, H))
    params['wv'] = stacked((H, H)); params['bv'] = stacked((1, H))
    params['wo'] = stacked((H, H)); params['bo'] = stacked((1, H))
    params['g1'] = jnp.ones((L, 1, H), jnp.float32)
    params['be1'] = jnp.zeros((L, 1, H), jnp.float32)
    params['w1'] = stacked((H, F)); params['b1'] = stacked((1, F))
    params['w2'] = stacked((F, H)); params['b2'] = stacked((1, H))
    params['g2'] = jnp.ones((L, 1, H), jnp.float32)
    params['be2'] = jnp.zeros((L, 1, H), jnp.float32)

    params['pw1'] = rnd((3 * H, H)); params['pb1'] = rnd((1, H))
    params['pw2'] = rnd((H, 1));     params['pb2'] = rnd((1, 1))
    return params


# --------------------------------- main ---------------------------------------


if __name__ == "__main__":
    B, S, H = 2, 8, 32
    num_heads, num_layers, ff_dim = 2, 2, 64
    item_vocab, max_seq_len = 50, 16
    field_dims = [10, 12, 8, 10]

    key = jax.random.PRNGKey(0)
    kp, ks, kt, kf = jax.random.split(key, 4)

    params = init_params(kp, item_vocab, field_dims, max_seq_len,
                         H, num_layers, ff_dim)

    seq_items = jax.random.randint(ks, (B, S), 0, item_vocab, dtype=jnp.int32)
    target_item = jax.random.randint(kt, (B,), 1, item_vocab, dtype=jnp.int32)
    fkeys = jax.random.split(kf, len(field_dims))
    target_features = jnp.stack(
        [jax.random.randint(fkeys[i], (B,), 0, d, dtype=jnp.int32)
         for i, d in enumerate(field_dims)], axis=1)  # (B, num_fields)

    pred, attn_list = bst_forward(params, seq_items, target_item,
                                  target_features, num_heads)
    pred = jax.block_until_ready(pred)

    # sanity check against a pure-JAX reference (approx reciprocal -> 2e-3 tol)
    pred_ref, attn_ref = reference_forward(params, seq_items, target_item,
                                           target_features, num_heads)
    assert pred.shape == (B, 1)
    assert jnp.allclose(pred, pred_ref, atol=2e-3, rtol=2e-3)
    for a, ar in zip(attn_list, attn_ref):
        assert a.shape == (B, num_heads, S, S)
        assert jnp.allclose(a, ar, atol=2e-3, rtol=2e-3)

    print("KERNEL_OK")
</pallas_src>

<mosaic_0001>
module attributes {stable_mosaic.version = 11 : i64} {
  func.func @_bst_kernel(%arg0: i32, %arg1: i32, %arg2: memref<8x32xf32, #tpu.memory_space<vmem>>, %arg3: memref<1x1x64xf32, #tpu.memory_space<vmem>>, %arg4: memref<1x32x96xf32, #tpu.memory_space<vmem>>, %arg5: memref<1x1x96xf32, #tpu.memory_space<vmem>>, %arg6: memref<1x32x32xf32, #tpu.memory_space<vmem>>, %arg7: memref<1x1x32xf32, #tpu.memory_space<vmem>>, %arg8: memref<1x1x32xf32, #tpu.memory_space<vmem>>, %arg9: memref<1x1x32xf32, #tpu.memory_space<vmem>>, %arg10: memref<1x32x64xf32, #tpu.memory_space<vmem>>, %arg11: memref<1x1x64xf32, #tpu.memory_space<vmem>>, %arg12: memref<1x64x32xf32, #tpu.memory_space<vmem>>, %arg13: memref<1x1x32xf32, #tpu.memory_space<vmem>>, %arg14: memref<1x1x32xf32, #tpu.memory_space<vmem>>, %arg15: memref<1x1x32xf32, #tpu.memory_space<vmem>>, %arg16: memref<96x32xf32, #tpu.memory_space<vmem>>, %arg17: memref<1x32xf32, #tpu.memory_space<vmem>>, %arg18: memref<32x1xf32, #tpu.memory_space<vmem>>, %arg19: memref<1x1xf32, #tpu.memory_space<vmem>>, %arg20: memref<1x2x1x8x8xf32, #tpu.memory_space<vmem>>, %arg21: memref<1x1x1xf32, #tpu.memory_space<vmem>>, %arg22: memref<8x32xf32, #tpu.memory_space<vmem>>, %arg23: memref<8x32xf32, #tpu.memory_space<vmem>>) attributes {dimension_semantics = [#tpu.dimension_semantics<parallel>, #tpu.dimension_semantics<arbitrary>], iteration_bounds = array<i64: 2, 2>, scalar_prefetch = 0 : i64, scratch_operands = 2 : i64, tpu.core_type = #tpu.core_type<tc>, window_params = [{transform_indices = @transform_0, window_bounds = array<i64: 8, 32>}, {transform_indices = @transform_1, window_bounds = array<i64: 1, 1, 64>}, {transform_indices = @transform_2, window_bounds = array<i64: 1, 32, 96>}, {transform_indices = @transform_3, window_bounds = array<i64: 1, 1, 96>}, {transform_indices = @transform_4, window_bounds = array<i64: 1, 32, 32>}, {transform_indices = @transform_5, window_bounds = array<i64: 1, 1, 32>}, {transform_indices = @transform_6, window_bounds = array<i64: 1, 1, 32>}, {transform_indices = @transform_7, window_bounds = array<i64: 1, 1, 32>}, {transform_indices = @transform_8, window_bounds = array<i64: 1, 32, 64>}, {transform_indices = @transform_9, window_bounds = array<i64: 1, 1, 64>}, {transform_indices = @transform_10, window_bounds = array<i64: 1, 64, 32>}, {transform_indices = @transform_11, window_bounds = array<i64: 1, 1, 32>}, {transform_indices = @transform_12, window_bounds = array<i64: 1, 1, 32>}, {transform_indices = @transform_13, window_bounds = array<i64: 1, 1, 32>}, {pipeline_mode = #tpu.pipeline_mode<synchronous>, transform_indices = @transform_14, window_bounds = array<i64: 96, 32>}, {pipeline_mode = #tpu.pipeline_mode<synchronous>, transform_indices = @transform_15, window_bounds = array<i64: 1, 32>}, {pipeline_mode = #tpu.pipeline_mode<synchronous>, transform_indices = @transform_16, window_bounds = array<i64: 32, 1>}, {pipeline_mode = #tpu.pipeline_mode<synchronous>, transform_indices = @transform_17, window_bounds = array<i64: 1, 1>}, {transform_indices = @transform_18, window_bounds = array<i64: 1, 2, 1, 8, 8>}, {transform_indices = @transform_19, window_bounds = array<i64: 1, 1, 1>}]} {
    %c0_i32 = arith.constant 0 : i32
    %0 = arith.cmpi eq, %arg1, %c0_i32 : i32
    %1 = arith.extui %0 : i1 to i32
    %c0_i32_0 = arith.constant 0 : i32
    %2 = arith.cmpi ne, %1, %c0_i32_0 : i32
    scf.if %2 {
      %c0_79 = arith.constant 0 : index
      %c0_80 = arith.constant 0 : index
      %143 = vector.load %arg2[%c0_79, %c0_80] : memref<8x32xf32, #tpu.memory_space<vmem>>, vector<8x32xf32>
      %c0_81 = arith.constant 0 : index
      %c0_82 = arith.constant 0 : index
      %144 = vector.load %arg22[%c0_81, %c0_82] : memref<8x32xf32, #tpu.memory_space<vmem>>, vector<8x32xf32>
      tpu.vector_store %arg22[%c0_81, %c0_82], %143 {strides = array<i32>} : memref<8x32xf32, #tpu.memory_space<vmem>>, vector<8x32xf32>,
    } else {
    }
    %c0 = arith.constant 0 : index
    %c0_1 = arith.constant 0 : index
    %3 = vector.load %arg22[%c0, %c0_1] : memref<8x32xf32, #tpu.memory_space<vmem>>, vector<8x32xf32>
    %c0_2 = arith.constant 0 : index
    %c0_3 = arith.constant 0 : index
    %c0_4 = arith.constant 0 : index
    %4 = vector.load %arg4[%c0_2, %c0_3, %c0_4] : memref<1x32x96xf32, #tpu.memory_space<vmem>>, vector<1x32x96xf32>
    %5 = vector.shape_cast %4 : vector<1x32x96xf32> to vector<32x96xf32>
    %cst = arith.constant dense<0.000000e+00> : vector<8x96xf32>
    %6 = tpu.matmul %3, %5, %cst {dimension_numbers = #tpu.dot_dimension_numbers<[1], [0], [0], [1], [0, 0, 1, 1], [], []>} : vector<8x32xf32>, vector<32x96xf32>, vector<8x96xf32> -> vector<8x96xf32>
    %c0_5 = arith.constant 0 : index
    %c0_6 = arith.constant 0 : index
    %c0_7 = arith.constant 0 : index
    %7 = vector.load %arg5[%c0_5, %c0_6, %c0_7] : memref<1x1x96xf32, #tpu.memory_space<vmem>>, vector<1x1x96xf32>
    %8 = vector.shape_cast %7 : vector<1x1x96xf32> to vector<1x96xf32>
    %9 = vector.broadcast %8 : vector<1x96xf32> to vector<8x96xf32>
    %10 = arith.addf %6, %9 : vector<8x96xf32>
    %11 = vector.extract_strided_slice %10 {offsets = [0, 0], sizes = [8, 32], strides = [1, 1]} : vector<8x96xf32> to vector<8x32xf32>
    %12 = vector.shape_cast %11 : vector<8x32xf32> to vector<1x8x32xf32>
    %13 = vector.extract_strided_slice %10 {offsets = [0, 32], sizes = [8, 32], strides = [1, 1]} : vector<8x96xf32> to vector<8x32xf32>
    %14 = vector.shape_cast %13 : vector<8x32xf32> to vector<1x8x32xf32>
    %15 = vector.extract_strided_slice %10 {offsets = [0, 64], sizes = [8, 32], strides = [1, 1]} : vector<8x96xf32> to vector<8x32xf32>
    %16 = vector.shape_cast %15 : vector<8x32xf32> to vector<1x8x32xf32>
    %17 = vector.extract_strided_slice %12 {offsets = [0, 0, 0], sizes = [1, 8, 16], strides = [1, 1, 1]} : vector<1x8x32xf32> to vector<1x8x16xf32>
    %18 = vector.extract_strided_slice %14 {offsets = [0, 0, 0], sizes = [1, 8, 16], strides = [1, 1, 1]} : vector<1x8x32xf32> to vector<1x8x16xf32>
    %19 = vector.extract_strided_slice %16 {offsets = [0, 0, 0], sizes = [1, 8, 16], strides = [1, 1, 1]} : vector<1x8x32xf32> to vector<1x8x16xf32>
    "tpu.trace_start"() <{level = 10 : i32, message = "bqd,bkd->bqk"}> : () -> ()
    %cst_8 = arith.constant dense<0.000000e+00> : vector<1x8x8xf32>
    %20 = tpu.matmul %17, %18, %cst_8 {dimension_numbers = #tpu.dot_dimension_numbers<[2], [2], [1], [1], [0, 0, 0, 1, 1, 1], [0], [0]>} : vector<1x8x16xf32>, vector<1x8x16xf32>, vector<1x8x8xf32> -> vector<1x8x8xf32>
    "tpu.trace_stop"() : () -> ()
    %cst_9 = arith.constant 2.500000e-01 : f32
    %21 = vector.broadcast %cst_9 : f32 to vector<1x8x8xf32>
    %22 = arith.mulf %20, %21 : vector<1x8x8xf32>
    %cst_10 = arith.constant dense<0xFF800000> : vector<1x8xf32>
    %23 = vector.multi_reduction <maximumf>, %22, %cst_10 [2] : vector<1x8x8xf32> to vector<1x8xf32>
    %24 = vector.shape_cast %23 : vector<1x8xf32> to vector<1x8x1xf32>
    %25 = vector.broadcast %24 : vector<1x8x1xf32> to vector<1x8x8xf32>
    %26 = arith.subf %22, %25 : vector<1x8x8xf32>
    %27 = math.exp %26 : vector<1x8x8xf32>
    %cst_11 = arith.constant dense<0.000000e+00> : vector<1x8xf32>
    %28 = vector.multi_reduction <add>, %27, %cst_11 [2] : vector<1x8x8xf32> to vector<1x8xf32>
    %29 = vector.shape_cast %28 : vector<1x8xf32> to vector<1x8x1xf32>
    %30 = tpu.reciprocal %29 {approx = true} : vector<1x8x1xf32> -> vector<1x8x1xf32>
    %31 = vector.broadcast %30 : vector<1x8x1xf32> to vector<1x8x8xf32>
    %32 = arith.mulf %27, %31 : vector<1x8x8xf32>
    %c0_12 = arith.constant 0 : index
    %c0_13 = arith.constant 0 : index
    %c0_14 = arith.constant 0 : index
    %c0_15 = arith.constant 0 : index
    %c0_16 = arith.constant 0 : index
    %33 = vector.load %arg20[%c0_12, %c0_13, %c0_14, %c0_15, %c0_16] : memref<1x2x1x8x8xf32, #tpu.memory_space<vmem>>, vector<1x1x1x8x8xf32>
    %34 = vector.shape_cast %33 : vector<1x1x1x8x8xf32> to vector<1x8x8xf32>
    %35 = vector.shape_cast %32 : vector<1x8x8xf32> to vector<1x1x1x8x8xf32>
    tpu.vector_store %arg20[%c0_12, %c0_13, %c0_14, %c0_15, %c0_16], %35 {strides = array<i32>} : memref<1x2x1x8x8xf32, #tpu.memory_space<vmem>>, vector<1x1x1x8x8xf32>,
    "tpu.trace_start"() <{level = 10 : i32, message = "bqk,bkd->bqd"}> : () -> ()
    %cst_17 = arith.constant dense<0.000000e+00> : vector<1x8x16xf32>
    %36 = tpu.matmul %32, %19, %cst_17 {dimension_numbers = #tpu.dot_dimension_numbers<[2], [1], [1], [2], [0, 0, 0, 1, 1, 2], [0], [0]>} : vector<1x8x8xf32>, vector<1x8x16xf32>, vector<1x8x16xf32> -> vector<1x8x16xf32>
    "tpu.trace_stop"() : () -> ()
    %37 = vector.shape_cast %36 : vector<1x8x16xf32> to vector<8x16xf32>
    %c0_18 = arith.constant 0 : index
    %c0_19 = arith.constant 0 : index
    %38 = vector.load %arg23[%c0_18, %c0_19] : memref<8x32xf32, #tpu.memory_space<vmem>>, vector<8x16xf32>
    tpu.vector_store %arg23[%c0_18, %c0_19], %37 {strides = array<i32>} : memref<8x32xf32, #tpu.memory_space<vmem>>, vector<8x16xf32>,
    %39 = vector.extract_strided_slice %12 {offsets = [0, 0, 16], sizes = [1, 8, 16], strides = [1, 1, 1]} : vector<1x8x32xf32> to vector<1x8x16xf32>
    %40 = vector.extract_strided_slice %14 {offsets = [0, 0, 16], sizes = [1, 8, 16], strides = [1, 1, 1]} : vector<1x8x32xf32> to vector<1x8x16xf32>
    %41 = vector.extract_strided_slice %16 {offsets = [0, 0, 16], sizes = [1, 8, 16], strides = [1, 1, 1]} : vector<1x8x32xf32> to vector<1x8x16xf32>
    "tpu.trace_start"() <{level = 10 : i32, message = "bqd,bkd->bqk"}> : () -> ()
    %cst_20 = arith.constant dense<0.000000e+00> : vector<1x8x8xf32>
    %42 = tpu.matmul %39, %40, %cst_20 {dimension_numbers = #tpu.dot_dimension_numbers<[2], [2], [1], [1], [0, 0, 0, 1, 1, 1], [0], [0]>} : vector<1x8x16xf32>, vector<1x8x16xf32>, vector<1x8x8xf32> -> vector<1x8x8xf32>
    "tpu.trace_stop"() : () -> ()
    %cst_21 = arith.constant 2.500000e-01 : f32
    %43 = vector.broadcast %cst_21 : f32 to vector<1x8x8xf32>
    %44 = arith.mulf %42, %43 : vector<1x8x8xf32>
    %cst_22 = arith.constant dense<0xFF800000> : vector<1x8xf32>
    %45 = vector.multi_reduction <maximumf>, %44, %cst_22 [2] : vector<1x8x8xf32> to vector<1x8xf32>
    %46 = vector.shape_cast %45 : vector<1x8xf32> to vector<1x8x1xf32>
    %47 = vector.broadcast %46 : vector<1x8x1xf32> to vector<1x8x8xf32>
    %48 = arith.subf %44, %47 : vector<1x8x8xf32>
    %49 = math.exp %48 : vector<1x8x8xf32>
    %cst_23 = arith.constant dense<0.000000e+00> : vector<1x8xf32>
    %50 = vector.multi_reduction <add>, %49, %cst_23 [2] : vector<1x8x8xf32> to vector<1x8xf32>
    %51 = vector.shape_cast %50 : vector<1x8xf32> to vector<1x8x1xf32>
    %52 = tpu.reciprocal %51 {approx = true} : vector<1x8x1xf32> -> vector<1x8x1xf32>
    %53 = vector.broadcast %52 : vector<1x8x1xf32> to vector<1x8x8xf32>
    %54 = arith.mulf %49, %53 : vector<1x8x8xf32>
    %c0_24 = arith.constant 0 : index
    %c1 = arith.constant 1 : index
    %c0_25 = arith.constant 0 : index
    %c0_26 = arith.constant 0 : index
    %c0_27 = arith.constant 0 : index
    %55 = vector.load %arg20[%c0_24, %c1, %c0_25, %c0_26, %c0_27] : memref<1x2x1x8x8xf32, #tpu.memory_space<vmem>>, vector<1x1x1x8x8xf32>
    %56 = vector.shape_cast %55 : vector<1x1x1x8x8xf32> to vector<1x8x8xf32>
    %57 = vector.shape_cast %54 : vector<1x8x8xf32> to vector<1x1x1x8x8xf32>
    tpu.vector_store %arg20[%c0_24, %c1, %c0_25, %c0_26, %c0_27], %57 {strides = array<i32>} : memref<1x2x1x8x8xf32, #tpu.memory_space<vmem>>, vector<1x1x1x8x8xf32>,
    "tpu.trace_start"() <{level = 10 : i32, message = "bqk,bkd->bqd"}> : () -> ()
    %cst_28 = arith.constant dense<0.000000e+00> : vector<1x8x16xf32>
    %58 = tpu.matmul %54, %41, %cst_28 {dimension_numbers = #tpu.dot_dimension_numbers<[2], [1], [1], [2], [0, 0, 0, 1, 1, 2], [0], [0]>} : vector<1x8x8xf32>, vector<1x8x16xf32>, vector<1x8x16xf32> -> vector<1x8x16xf32>
    "tpu.trace_stop"() : () -> ()
    %59 = vector.shape_cast %58 : vector<1x8x16xf32> to vector<8x16xf32>
    %c0_29 = arith.constant 0 : index
    %c16 = arith.constant 16 : index
    %60 = vector.load %arg23[%c0_29, %c16] : memref<8x32xf32, #tpu.memory_space<vmem>>, vector<8x16xf32>
    tpu.vector_store %arg23[%c0_29, %c16], %59 {strides = array<i32>} : memref<8x32xf32, #tpu.memory_space<vmem>>, vector<8x16xf32>,
    %c0_30 = arith.constant 0 : index
    %c0_31 = arith.constant 0 : index
    %61 = vector.load %arg23[%c0_30, %c0_31] : memref<8x32xf32, #tpu.memory_space<vmem>>, vector<8x32xf32>
    %c0_32 = arith.constant 0 : index
    %c0_33 = arith.constant 0 : index
    %c0_34 = arith.constant 0 : index
    %62 = vector.load %arg6[%c0_32, %c0_33, %c0_34] : memref<1x32x32xf32, #tpu.memory_space<vmem>>, vector<1x32x32xf32>
    %63 = vector.shape_cast %62 : vector<1x32x32xf32> to vector<32x32xf32>
    %cst_35 = arith.constant dense<0.000000e+00> : vector<8x32xf32>
    %64 = tpu.matmul %61, %63, %cst_35 {dimension_numbers = #tpu.dot_dimension_numbers<[1], [0], [0], [1], [0, 0, 1, 1], [], []>} : vector<8x32xf32>, vector<32x32xf32>, vector<8x32xf32> -> vector<8x32xf32>
    %c0_36 = arith.constant 0 : index
    %c0_37 = arith.constant 0 : index
    %c0_38 = arith.constant 0 : index
    %65 = vector.load %arg7[%c0_36, %c0_37, %c0_38] : memref<1x1x32xf32, #tpu.memory_space<vmem>>, vector<1x1x32xf32>
    %66 = vector.shape_cast %65 : vector<1x1x32xf32> to vector<1x32xf32>
    %67 = vector.broadcast %66 : vector<1x32xf32> to vector<8x32xf32>
    %68 = arith.addf %64, %67 : vector<8x32xf32>
    %69 = arith.addf %3, %68 : vector<8x32xf32>
    %c0_39 = arith.constant 0 : index
    %c0_40 = arith.constant 0 : index
    %c0_41 = arith.constant 0 : index
    %70 = vector.load %arg8[%c0_39, %c0_40, %c0_41] : memref<1x1x32xf32, #tpu.memory_space<vmem>>, vector<1x1x32xf32>
    %71 = vector.shape_cast %70 : vector<1x1x32xf32> to vector<1x32xf32>
    %c0_42 = arith.constant 0 : index
    %c0_43 = arith.constant 0 : index
    %c0_44 = arith.constant 0 : index
    %72 = vector.load %arg9[%c0_42, %c0_43, %c0_44] : memref<1x1x32xf32, #tpu.memory_space<vmem>>, vector<1x1x32xf32>
    %73 = vector.shape_cast %72 : vector<1x1x32xf32> to vector<1x32xf32>
    %cst_45 = arith.constant dense<0.000000e+00> : vector<8xf32>
    %74 = vector.multi_reduction <add>, %69, %cst_45 [1] : vector<8x32xf32> to vector<8xf32>
    %75 = vector.shape_cast %74 : vector<8xf32> to vector<8x1xf32>
    %cst_46 = arith.constant 3.200000e+01 : f32
    %76 = vector.broadcast %cst_46 : f32 to vector<8x1xf32>
    %77 = arith.divf %75, %76 : vector<8x1xf32>
    %78 = vector.broadcast %77 : vector<8x1xf32> to vector<8x32xf32>
    %79 = arith.subf %69, %78 : vector<8x32xf32>
    %80 = arith.mulf %79, %79 : vector<8x32xf32>
    %cst_47 = arith.constant dense<0.000000e+00> : vector<8xf32>
    %81 = vector.multi_reduction <add>, %80, %cst_47 [1] : vector<8x32xf32> to vector<8xf32>
    %82 = vector.shape_cast %81 : vector<8xf32> to vector<8x1xf32>
    %cst_48 = arith.constant 3.200000e+01 : f32
    %83 = vector.broadcast %cst_48 : f32 to vector<8x1xf32>
    %84 = arith.divf %82, %83 : vector<8x1xf32>
    %85 = vector.broadcast %77 : vector<8x1xf32> to vector<8x32xf32>
    %86 = arith.subf %69, %85 : vector<8x32xf32>
    %cst_49 = arith.constant 9.99999974E-6 : f32
    %87 = vector.broadcast %cst_49 : f32 to vector<8x1xf32>
    %88 = arith.addf %84, %87 : vector<8x1xf32>
    %89 = math.rsqrt %88 : vector<8x1xf32>
    %90 = vector.broadcast %89 : vector<8x1xf32> to vector<8x32xf32>
    %91 = arith.mulf %86, %90 : vector<8x32xf32>
    %92 = vector.broadcast %71 : vector<1x32xf32> to vector<8x32xf32>
    %93 = arith.mulf %91, %92 : vector<8x32xf32>
    %94 = vector.broadcast %73 : vector<1x32xf32> to vector<8x32xf32>
    %95 = arith.addf %93, %94 : vector<8x32xf32>
    %c0_50 = arith.constant 0 : index
    %c0_51 = arith.constant 0 : index
    %c0_52 = arith.constant 0 : index
    %96 = vector.load %arg10[%c0_50, %c0_51, %c0_52] : memref<1x32x64xf32, #tpu.memory_space<vmem>>, vector<1x32x64xf32>
    %97 = vector.shape_cast %96 : vector<1x32x64xf32> to vector<32x64xf32>
    %cst_53 = arith.constant dense<0.000000e+00> : vector<8x64xf32>
    %98 = tpu.matmul %95, %97, %cst_53 {dimension_numbers = #tpu.dot_dimension_numbers<[1], [0], [0], [1], [0, 0, 1, 1], [], []>} : vector<8x32xf32>, vector<32x64xf32>, vector<8x64xf32> -> vector<8x64xf32>
    %c0_54 = arith.constant 0 : index
    %c0_55 = arith.constant 0 : index
    %c0_56 = arith.constant 0 : index
    %99 = vector.load %arg11[%c0_54, %c0_55, %c0_56] : memref<1x1x64xf32, #tpu.memory_space<vmem>>, vector<1x1x64xf32>
    %100 = vector.shape_cast %99 : vector<1x1x64xf32> to vector<1x64xf32>
    %101 = vector.broadcast %100 : vector<1x64xf32> to vector<8x64xf32>
    %102 = arith.addf %98, %101 : vector<8x64xf32>
    %cst_57 = arith.constant 0.000000e+00 : f32
    %103 = vector.broadcast %cst_57 : f32 to vector<8x64xf32>
    %104 = arith.maximumf %102, %103 : vector<8x64xf32>
    %c0_58 = arith.constant 0 : index
    %c0_59 = arith.constant 0 : index
    %c0_60 = arith.constant 0 : index
    %105 = vector.load %arg12[%c0_58, %c0_59, %c0_60] : memref<1x64x32xf32, #tpu.memory_space<vmem>>, vector<1x64x32xf32>
    %106 = vector.shape_cast %105 : vector<1x64x32xf32> to vector<64x32xf32>
    %cst_61 = arith.constant dense<0.000000e+00> : vector<8x32xf32>
    %107 = tpu.matmul %104, %106, %cst_61 {dimension_numbers = #tpu.dot_dimension_numbers<[1], [0], [0], [1], [0, 0, 1, 1], [], []>} : vector<8x64xf32>, vector<64x32xf32>, vector<8x32xf32> -> vector<8x32xf32>
    %c0_62 = arith.constant 0 : index
    %c0_63 = arith.constant 0 : index
    %c0_64 = arith.constant 0 : index
    %108 = vector.load %arg13[%c0_62, %c0_63, %c0_64] : memref<1x1x32xf32, #tpu.memory_space<vmem>>, vector<1x1x32xf32>
    %109 = vector.shape_cast %108 : vector<1x1x32xf32> to vector<1x32xf32>
    %110 = vector.broadcast %109 : vector<1x32xf32> to vector<8x32xf32>
    %111 = arith.addf %107, %110 : vector<8x32xf32>
    %112 = arith.addf %95, %111 : vector<8x32xf32>
    %c0_65 = arith.constant 0 : index
    %c0_66 = arith.constant 0 : index
    %c0_67 = arith.constant 0 : index
    %113 = vector.load %arg14[%c0_65, %c0_66, %c0_67] : memref<1x1x32xf32, #tpu.memory_space<vmem>>, vector<1x1x32xf32>
    %114 = vector.shape_cast %113 : vector<1x1x32xf32> to vector<1x32xf32>
    %c0_68 = arith.constant 0 : index
    %c0_69 = arith.constant 0 : index
    %c0_70 = arith.constant 0 : index
    %115 = vector.load %arg15[%c0_68, %c0_69, %c0_70] : memref<1x1x32xf32, #tpu.memory_space<vmem>>, vector<1x1x32xf32>
    %116 = vector.shape_cast %115 : vector<1x1x32xf32> to vector<1x32xf32>
    %cst_71 = arith.constant dense<0.000000e+00> : vector<8xf32>
    %117 = vector.multi_reduction <add>, %112, %cst_71 [1] : vector<8x32xf32> to vector<8xf32>
    %118 = vector.shape_cast %117 : vector<8xf32> to vector<8x1xf32>
    %cst_72 = arith.constant 3.200000e+01 : f32
    %119 = vector.broadcast %cst_72 : f32 to vector<8x1xf32>
    %120 = arith.divf %118, %119 : vector<8x1xf32>
    %121 = vector.broadcast %120 : vector<8x1xf32> to vector<8x32xf32>
    %122 = arith.subf %112, %121 : vector<8x32xf32>
    %123 = arith.mulf %122, %122 : vector<8x32xf32>
    %cst_73 = arith.constant dense<0.000000e+00> : vector<8xf32>
    %124 = vector.multi_reduction <add>, %123, %cst_73 [1] : vector<8x32xf32> to vector<8xf32>
    %125 = vector.shape_cast %124 : vector<8xf32> to vector<8x1xf32>
    %cst_74 = arith.constant 3.200000e+01 : f32
    %126 = vector.broadcast %cst_74 : f32 to vector<8x1xf32>
    %127 = arith.divf %125, %126 : vector<8x1xf32>
    %128 = vector.broadcast %120 : vector<8x1xf32> to vector<8x32xf32>
    %129 = arith.subf %112, %128 : vector<8x32xf32>
    %cst_75 = arith.constant 9.99999974E-6 : f32
    %130 = vector.broadcast %cst_75 : f32 to vector<8x1xf32>
    %131 = arith.addf %127, %130 : vector<8x1xf32>
    %132 = math.rsqrt %131 : vector<8x1xf32>
    %133 = vector.broadcast %132 : vector<8x1xf32> to vector<8x32xf32>
    %134 = arith.mulf %129, %133 : vector<8x32xf32>
    %135 = vector.broadcast %114 : vector<1x32xf32> to vector<8x32xf32>
    %136 = arith.mulf %134, %135 : vector<8x32xf32>
    %137 = vector.broadcast %116 : vector<1x32xf32> to vector<8x32xf32>
    %138 = arith.addf %136, %137 : vector<8x32xf32>
    %c0_76 = arith.constant 0 : index
    %c0_77 = arith.constant 0 : index
    %139 = vector.load %arg22[%c0_76, %c0_77] : memref<8x32xf32, #tpu.memory_space<vmem>>, vector<8x32xf32>
    tpu.vector_store %arg22[%c0_76, %c0_77], %138 {strides = array<i32>} : memref<8x32xf32, #tpu.memory_space<vmem>>, vector<8x32xf32>,
    %c1_i32 = arith.constant 1 : i32
    %140 = arith.cmpi eq, %arg1, %c1_i32 : i32
    %141 = arith.extui %140 : i1 to i32
    %c0_i32_78 = arith.constant 0 : i32
    %142 = arith.cmpi ne, %141, %c0_i32_78 : i32
    scf.if %142 {
      %143 = vector.shape_cast %138 : vector<8x32xf32> to vector<1x8x32xf32>
      %144 = vector.extract_strided_slice %143 {offsets = [0, 7, 0], sizes = [1, 1, 32], strides = [1, 1, 1]} : vector<1x8x32xf32> to vector<1x1x32xf32>
      %145 = vector.shape_cast %144 : vector<1x1x32xf32> to vector<1x32xf32>
      %c0_79 = arith.constant 0 : index
      %c0_80 = arith.constant 0 : index
      %c0_81 = arith.constant 0 : index
      %146 = vector.load %arg3[%c0_79, %c0_80, %c0_81] : memref<1x1x64xf32, #tpu.memory_space<vmem>>, vector<1x1x64xf32>
      %147 = vector.shape_cast %146 : vector<1x1x64xf32> to vector<1x64xf32>
      %c0_82 = arith.constant 0 : index
      %c0_83 = arith.constant 0 : index
      %148 = vector.load %arg16[%c0_82, %c0_83] : memref<96x32xf32, #tpu.memory_space<vmem>>, vector<32x32xf32>
      %cst_84 = arith.constant dense<0.000000e+00> : vector<1x32xf32>
      %149 = tpu.matmul %145, %148, %cst_84 {dimension_numbers = #tpu.dot_dimension_numbers<[1], [0], [0], [1], [0, 0, 1, 1], [], []>} : vector<1x32xf32>, vector<32x32xf32>, vector<1x32xf32> -> vector<1x32xf32>
      %c32 = arith.constant 32 : index
      %c0_85 = arith.constant 0 : index
      %150 = vector.load %arg16[%c32, %c0_85] : memref<96x32xf32, #tpu.memory_space<vmem>>, vector<64x32xf32>
      %cst_86 = arith.constant dense<0.000000e+00> : vector<1x32xf32>
      %151 = tpu.matmul %147, %150, %cst_86 {dimension_numbers = #tpu.dot_dimension_numbers<[1], [0], [0], [1], [0, 0, 1, 1], [], []>} : vector<1x64xf32>, vector<64x32xf32>, vector<1x32xf32> -> vector<1x32xf32>
      %152 = arith.addf %149, %151 : vector<1x32xf32>
      %c0_87 = arith.constant 0 : index
      %c0_88 = arith.constant 0 : index
      %153 = vector.load %arg17[%c0_87, %c0_88] : memref<1x32xf32, #tpu.memory_space<vmem>>, vector<1x32xf32>
      %154 = arith.addf %152, %153 : vector<1x32xf32>
      %cst_89 = arith.constant 0.000000e+00 : f32
      %155 = vector.broadcast %cst_89 : f32 to vector<1x32xf32>
      %156 = arith.maximumf %154, %155 : vector<1x32xf32>
      %c0_90 = arith.constant 0 : index
      %c0_91 = arith.constant 0 : index
      %157 = vector.load %arg18[%c0_90, %c0_91] : memref<32x1xf32, #tpu.memory_space<vmem>>, vector<32x1xf32>
      %cst_92 = arith.constant dense<0.000000e+00> : vector<1x1xf32>
      %158 = tpu.matmul %156, %157, %cst_92 {dimension_numbers = #tpu.dot_dimension_numbers<[1], [0], [0], [1], [0, 0, 1, 1], [], []>} : vector<1x32xf32>, vector<32x1xf32>, vector<1x1xf32> -> vector<1x1xf32>
      %c0_93 = arith.constant 0 : index
      %c0_94 = arith.constant 0 : index
      %159 = vector.load %arg19[%c0_93, %c0_94] : memref<1x1xf32, #tpu.memory_space<vmem>>, vector<1x1xf32>
      %160 = arith.addf %158, %159 : vector<1x1xf32>
      %cst_95 = arith.constant 0.000000e+00 : f32
      %161 = vector.broadcast %cst_95 : f32 to vector<1x1xf32>
      %162 = arith.subf %161, %160 : vector<1x1xf32>
      %163 = math.exp %162 : vector<1x1xf32>
      %cst_96 = arith.constant 1.000000e+00 : f32
      %164 = vector.broadcast %cst_96 : f32 to vector<1x1xf32>
      %165 = arith.addf %164, %163 : vector<1x1xf32>
      %cst_97 = arith.constant 1.000000e+00 : f32
      %166 = vector.broadcast %cst_97 : f32 to vector<1x1xf32>
      %167 = arith.divf %166, %165 : vector<1x1xf32>
      %c0_98 = arith.constant 0 : index
      %c0_99 = arith.constant 0 : index
      %c0_100 = arith.constant 0 : index
      %168 = vector.load %arg21[%c0_98, %c0_99, %c0_100] : memref<1x1x1xf32, #tpu.memory_space<vmem>>, vector<1x1x1xf32>
      %169 = vector.shape_cast %168 : vector<1x1x1xf32> to vector<1x1xf32>
      %170 = vector.shape_cast %167 : vector<1x1xf32> to vector<1x1x1xf32>
      tpu.vector_store %arg21[%c0_98, %c0_99, %c0_100], %170 {strides = array<i32>} : memref<1x1x1xf32, #tpu.memory_space<vmem>>, vector<1x1x1xf32>,
    } else {
    }
    return
  }
  func.func @transform_0(%arg0: i32, %arg1: i32) -> (i32, i32) {
    %c0_i32 = arith.constant 0 : i32
    %c0_i32_0 = arith.constant 0 : i32
    return %arg0, %c0_i32 : i32, i32
  }
  func.func @transform_1(%arg0: i32, %arg1: i32) -> (i32, i32, i32) {
    %c0_i32 = arith.constant 0 : i32
    %c0_i32_0 = arith.constant 0 : i32
    %c0_i32_1 = arith.constant 0 : i32
    return %arg0, %c0_i32, %c0_i32_0 : i32, i32, i32
  }
  func.func @transform_2(%arg0: i32, %arg1: i32) -> (i32, i32, i32) {
    %c0_i32 = arith.constant 0 : i32
    %c0_i32_0 = arith.constant 0 : i32
    %c0_i32_1 = arith.constant 0 : i32
    return %arg1, %c0_i32, %c0_i32_0 : i32, i32, i32
  }
  func.func @transform_3(%arg0: i32, %arg1: i32) -> (i32, i32, i32) {
    %c0_i32 = arith.constant 0 : i32
    %c0_i32_0 = arith.constant 0 : i32
    %c0_i32_1 = arith.constant 0 : i32
    return %arg1, %c0_i32, %c0_i32_0 : i32, i32, i32
  }
  func.func @transform_4(%arg0: i32, %arg1: i32) -> (i32, i32, i32) {
    %c0_i32 = arith.constant 0 : i32
    %c0_i32_0 = arith.constant 0 : i32
    %c0_i32_1 = arith.constant 0 : i32
    return %arg1, %c0_i32, %c0_i32_0 : i32, i32, i32
  }
  func.func @transform_5(%arg0: i32, %arg1: i32) -> (i32, i32, i32) {
    %c0_i32 = arith.constant 0 : i32
    %c0_i32_0 = arith.constant 0 : i32
    %c0_i32_1 = arith.constant 0 : i32
    return %arg1, %c0_i32, %c0_i32_0 : i32, i32, i32
  }
  func.func @transform_6(%arg0: i32, %arg1: i32) -> (i32, i32, i32) {
    %c0_i32 = arith.constant 0 : i32
    %c0_i32_0 = arith.constant 0 : i32
    %c0_i32_1 = arith.constant 0 : i32
    return %arg1, %c0_i32, %c0_i32_0 : i32, i32, i32
  }
  func.func @transform_7(%arg0: i32, %arg1: i32) -> (i32, i32, i32) {
    %c0_i32 = arith.constant 0 : i32
    %c0_i32_0 = arith.constant 0 : i32
    %c0_i32_1 = arith.constant 0 : i32
    return %arg1, %c0_i32, %c0_i32_0 : i32, i32, i32
  }
  func.func @transform_8(%arg0: i32, %arg1: i32) -> (i32, i32, i32) {
    %c0_i32 = arith.constant 0 : i32
    %c0_i32_0 = arith.constant 0 : i32
    %c0_i32_1 = arith.constant 0 : i32
    return %arg1, %c0_i32, %c0_i32_0 : i32, i32, i32
  }
  func.func @transform_9(%arg0: i32, %arg1: i32) -> (i32, i32, i32) {
    %c0_i32 = arith.constant 0 : i32
    %c0_i32_0 = arith.constant 0 : i32
    %c0_i32_1 = arith.constant 0 : i32
    return %arg1, %c0_i32, %c0_i32_0 : i32, i32, i32
  }
  func.func @transform_10(%arg0: i32, %arg1: i32) -> (i32, i32, i32) {
    %c0_i32 = arith.constant 0 : i32
    %c0_i32_0 = arith.constant 0 : i32
    %c0_i32_1 = arith.constant 0 : i32
    return %arg1, %c0_i32, %c0_i32_0 : i32, i32, i32
  }
  func.func @transform_11(%arg0: i32, %arg1: i32) -> (i32, i32, i32) {
    %c0_i32 = arith.constant 0 : i32
    %c0_i32_0 = arith.constant 0 : i32
    %c0_i32_1 = arith.constant 0 : i32
    return %arg1, %c0_i32, %c0_i32_0 : i32, i32, i32
  }
  func.func @transform_12(%arg0: i32, %arg1: i32) -> (i32, i32, i32) {
    %c0_i32 = arith.constant 0 : i32
    %c0_i32_0 = arith.constant 0 : i32
    %c0_i32_1 = arith.constant 0 : i32
    return %arg1, %c0_i32, %c0_i32_0 : i32, i32, i32
  }
  func.func @transform_13(%arg0: i32, %arg1: i32) -> (i32, i32, i32) {
    %c0_i32 = arith.constant 0 : i32
    %c0_i32_0 = arith.constant 0 : i32
    %c0_i32_1 = arith.constant 0 : i32
    return %arg1, %c0_i32, %c0_i32_0 : i32, i32, i32
  }
  func.func @transform_14(%arg0: i32, %arg1: i32) -> (i32, i32) {
    %c0_i32 = arith.constant 0 : i32
    %c0_i32_0 = arith.constant 0 : i32
    %c0_i32_1 = arith.constant 0 : i32
    return %c0_i32, %c0_i32_0 : i32, i32
  }
  func.func @transform_15(%arg0: i32, %arg1: i32) -> (i32, i32) {
    %c0_i32 = arith.constant 0 : i32
    %c0_i32_0 = arith.constant 0 : i32
    %c0_i32_1 = arith.constant 0 : i32
    return %c0_i32, %c0_i32_0 : i32, i32
  }
  func.func @transform_16(%arg0: i32, %arg1: i32) -> (i32, i32) {
    %c0_i32 = arith.constant 0 : i32
    %c0_i32_0 = arith.constant 0 : i32
    %c0_i32_1 = arith.constant 0 : i32
    return %c0_i32, %c0_i32_0 : i32, i32
  }
  func.func @transform_17(%arg0: i32, %arg1: i32) -> (i32, i32) {
    %c0_i32 = arith.constant 0 : i32
    %c0_i32_0 = arith.constant 0 : i32
    %c0_i32_1 = arith.constant 0 : i32
    return %c0_i32, %c0_i32_0 : i32, i32
  }
  func.func @transform_18(%arg0: i32, %arg1: i32) -> (i32, i32, i32, i32, i32) {
    %c0_i32 = arith.constant 0 : i32
    %c0_i32_0 = arith.constant 0 : i32
    %c0_i32_1 = arith.constant 0 : i32
    %c0_i32_2 = arith.constant 0 : i32
    return %arg1, %c0_i32, %arg0, %c0_i32_0, %c0_i32_1 : i32, i32, i32, i32, i32
  }
  func.func @transform_19(%arg0: i32, %arg1: i32) -> (i32, i32, i32) {
    %c0_i32 = arith.constant 0 : i32
    %c0_i32_0 = arith.constant 0 : i32
    %c0_i32_1 = arith.constant 0 : i32
    return %arg0, %c0_i32, %c0_i32_0 : i32, i32, i32
  }
}

</mosaic_0001>

<bundles_post_ra>
// kernel: tpu_custom_call.1
= control target key start
LH: loop header
LB: loop body
LE: loop exit
PB: predicated region body
PF: predicated region fallthrough
CT: control target
= control target key end

     0   :  { %s3061_s0 = inlined_call_operand.vmem [shape: f32[16,32], index: 0, kind: input, shape index: {}]   ;;  %s3062_s1 = inlined_call_operand.vmem [shape: f32[2,1,64], index: 1, kind: input, shape index: {}]   ;;  %s3063_s2 = inlined_call_operand.vmem [shape: f32[2,32,96], index: 2, kind: input, shape index: {}]   ;;  %s3064_s3 = inlined_call_operand.vmem [shape: f32[2,1,96], index: 3, kind: input, shape index: {}]   ;;  %s3065_s4 = inlined_call_operand.vmem [shape: f32[2,32,32], index: 4, kind: input, shape index: {}]   ;;  %s3066_s5 = inlined_call_operand.vmem [shape: f32[2,1,32], index: 5, kind: input, shape index: {}]   ;;  %s3067_s6 = inlined_call_operand.vmem [shape: f32[2,1,32], index: 6, kind: input, shape index: {}]   ;;  %s3068_s7 = inlined_call_operand.vmem [shape: f32[2,1,32], index: 7, kind: input, shape index: {}]   ;;  %s3069_s8 = inlined_call_operand.vmem [shape: f32[2,32,64], index: 8, kind: input, shape index: {}]   ;;  %s3070_s9 = inlined_call_operand.vmem [shape: f32[2,1,64], index: 9, kind: input, shape index: {}]   ;;  %s3071_s10 = inlined_call_operand.vmem [shape: f32[2,64,32], index: 10, kind: input, shape index: {}]   ;;  %s3072_s11 = inlined_call_operand.vmem [shape: f32[2,1,32], index: 11, kind: input, shape index: {}]   ;;  %s3073_s12 = inlined_call_operand.vmem [shape: f32[2,1,32], index: 12, kind: input, shape index: {}]   ;;  %s3074_s13 = inlined_call_operand.vmem [shape: f32[2,1,32], index: 13, kind: input, shape index: {}]   ;;  %s3075_s14 = inlined_call_operand.vmem [shape: f32[96,32], index: 14, kind: input, shape index: {}]   ;;  %s3076_s15 = inlined_call_operand.vmem [shape: f32[1,32], index: 15, kind: input, shape index: {}]   ;;  %s3077_s16 = inlined_call_operand.vmem [shape: f32[32,1], index: 16, kind: input, shape index: {}]   ;;  %s3078_s17 = inlined_call_operand.<no memory space> [shape: f32[1,1], index: 17, kind: input, shape index: {}]   ;;  %s3079_s18 = inlined_call_operand.hbm [shape: f32[2,2,2,8,8], index: 18, kind: output, shape index: {0}]   ;;  %s3080_s19 = inlined_call_operand.vmem [shape: f32[2,1,1], index: 19, kind: output, shape index: {1}]  }
   0x1   :  { %3099 = sst [smem:[#allocation21_spill]] %s3061_s0  ;;  %v25_v0 = vstv %s3078_s17 }
   0x2   :  { %3100 = sst [smem:[#allocation22_spill]] %s3062_s1  ;;  %26 = vst [vmem:[#allocation4] sm:$0x1] %v25_v0 }
   0x3   :  { %3101 = sst [smem:[#allocation23_spill]] %s3063_s2 }
   0x4   :  { %3102 = sst [smem:[#allocation24_spill]] %s3064_s3 }
   0x5   :  { %3103 = sst [smem:[#allocation25_spill]] %s3065_s4 }
   0x6   :  { %3104 = sst [smem:[#allocation26_spill]] %s3068_s7 }
   0x7   :  { %3105 = sst [smem:[#allocation27_spill]] %s3069_s8 }
   0x8   :  { %3106 = sst [smem:[#allocation28_spill]] %s3070_s9 }
   0x9   :  { %3107 = sst [smem:[#allocation29_spill]] %s3073_s12 }
   0xa   :  { %3108 = sst [smem:[#allocation30_spill]] %s3074_s13 }
   0xb   :  { %3109 = sst [smem:[#allocation31_spill]] %s3075_s14 }
   0xc   :  { %3110 = sst [smem:[#allocation32_spill]] %s3076_s15 }
   0xd   :  { %3111 = sst [smem:[#allocation33_spill]] %s3077_s16 }
   0xe   :  { %3112 = sst [smem:[#allocation34_spill]] %s3079_s18 }
   0xf   :  { %3113 = sst [smem:[#allocation35_spill]] %s3080_s19 }
  0x10   :  { %27 = vsyncpa [#allocation6], 0 }
  0x11   :  { %29 = vsyncpa [#allocation6 + $0x1], 0  ;;  %s2666_s20 = smov 0   ;;  %s2668_s21 = smov 0  }
  0x12   :  { %s2670_s1 = smov 0   ;;  %s2672_s22 = smov 0  }
  0x13   :  { %s2674_s2 = smov 0   ;;  %s2676_s23 = smov 0  }
  0x14   :  { %s2678_s24 = smov 0   ;;  %s2680_s25 = smov 0  }
  0x15 LB: > { %3114 = sst [smem:[#allocation8_spill]] %s2517_s20  ;;  %s2083_s17 = sadd.s32 4294967295, %s2545_s25   ;;  %s2545_s25 = sphi %s2680_s25, %s35_s25   ;;  %s2541_s24 = sphi %s2678_s24, %s3174_s24   ;;  %s2537_s23 = sphi %s2676_s23, %s3173_s23   ;;  %s2533_s2 = sphi %s2674_s2, %s3172_s2   ;;  %s2529_s22 = sphi %s2672_s22, %s3171_s22   ;;  %s2525_s1 = sphi %s2670_s1, %s3170_s1   ;;  %s2521_s21 = sphi %s2668_s21, %s3169_s21   ;;  %s2517_s20 = sphi %s2666_s20, %s3168_s20  }
  0x16   : > { %3115 = sst [smem:[#allocation9_spill]] %s2521_s21  ;;  %s2084_s3 = sadd.s32 4294967294, %s2545_s25  }
  0x17   : > { %3116 = sst [smem:[#allocation10_spill]] %s2525_s1  ;;  %s44_s26 = sadd.s32 1, %s2537_s23 }
  0x18   : > { %3117 = sst [smem:[#allocation11_spill]] %s2529_s22  ;;  %p45_p0 = scmp.ge.s32.totalorder %s44_s26, 2 }
  0x19   : > { %3118 = sst [smem:[#allocation12_spill]] %s2533_s2  ;;  %s47_s27 = sadd.s32 1, %s2541_s24 }
  0x1a   : > { %3119 = sst [smem:[#allocation13_spill]] %s2537_s23  ;;  %p514_p1 = scmp.ne.s32.totalorder %s2525_s1, %s2521_s21 }
  0x1b   : > { %3120 = sst [smem:[#allocation14_spill]] %s2541_s24  ;;  %p515_p2 = scmp.eq.s32.totalorder %s2083_s17, 3 }
  0x1c   : > { %3121 = sst [smem:[#allocation15_spill]] %s2545_s25  ;;  %s3176_s26 = smov (%p45_p0, %s44_s26), 0 }
  0x1d   : > { %3122 = sst [smem:[#allocation16_spill]] %s3176_s26  ;;  %s3178_s27 = smov (!%p45_p0, %s47_s27), %s2541_s24 }
  0x1e   : > { %s499_s28 = ssub.s32 %s2537_s23, %s3176_s26  ;;  %p2717_p3 = por %p515_p2, %p514_p1 }
  0x1f   : > { %p49_p4 = scmp.ge.s32.totalorder %s3178_s27, 2  ;;  %p520_p5 = scmp.ne.s32.totalorder %s2521_s21, %s2517_s20 }
  0x20   : > { %s3123_s29 = scalar_select %p2717_p3, 1, 0 }
  0x21   : > { %p521_p6 = scmp.eq.s32.totalorder %s2084_s3, 3  ;;  %p2087_p7 = scmp.ge.s32.totalorder %s2545_s25, 1 }
  0x22   : > { %3124 = sst [smem:[#allocation17_spill]] %s3123_s29  ;;  %s3180_s27 = smov (%p49_p4, %s3178_s27), 0 }
  0x23   : > { %3125 = sst [smem:[#allocation18_spill]] %s3180_s27  ;;  %p2726_p8 = por %p521_p6, %p520_p5 }
  0x24   : > { %p670_p9 = scmp.lt.s32.totalorder %s2545_s25, 5  ;;  %s500_s30 = ssub.s32 %s2541_s24, %s3180_s27 }
  0x25   : > { %s3126_s0 = scalar_select %p2726_p8, 1, 0 }
  0x26   : > { %s504_s17 = sadd.s32 1, %s2525_s1  ;;  %s501_s18 = sor.u32 %s500_s30, %s499_s28 }
  0x27   : > { %3127 = sst [smem:[#allocation19_spill]] %s3126_s0  ;;  %p671_p10 = pnand %p2087_p7, %p670_p9 }
  0x28   : > { %p502_p11 = scmp.eq.s32.totalorder %s501_s18, 0  ;;  %s3085_s3 = sand.u32 (!%p671_p10), 1, %s2521_s21  }
  0x29   : > { %674 = sbr.rel (%p671_p10) target bundleno = 3041 (0xbe1), region = 92  ;;  %p775_p12 = scmp.lt.s32.totalorder (!%p671_p10), %s2533_s2, 1 }
  0x2a   : > { %s2735_s26 = scalar_select %p502_p11, %s2525_s1, %s504_s17  }
  0x2b   : > { %s2088_s23 = sshll.u32 (!%p671_p10), %s3085_s3, 4  ;;  %p782_p13 = scmp.lt.s32.totalorder (!%p671_p10), %s2529_s22, 1 }
  0x2c   : > { %3128 = sst [smem:[#allocation20_spill]] %s2735_s26  ;;  %s3130_s1 = sld [smem:[#allocation21_spill]] (!%p671_p10) }
  0x2d   : > { %s3133_s4 = sld [smem:[#allocation25_spill]] (!%p671_p10)  ;;  %s3135_s8 = sld [smem:[#allocation27_spill]] (!%p671_p10) }
  0x2e   : > { %s2812_s7 = scalar_lea.vmem (!%p671_p10), [#allocation5], %s2088_s23  ;;  %s3140_s3 = sld [smem:[#allocation11_spill]] (!%p671_p10) }
  0x30   : > { %s2743_s0 = scalar_select %p775_p12, %s2533_s2, 1 }
  0x31   : > { %s2746_s28 = scalar_select %p782_p13, %s2529_s22, 1 }
  0x32   : > { %s2089_s18 = sshll.u32 %s2743_s0, 3  ;;  %s3131_s2 = sld [smem:[#allocation23_spill]] }
  0x33   : > { %s778_s20 = scalar_lea.vmem %s3130_s1, %s2089_s18  ;;  %s2127_s25 = sshll.u32 %s2746_s28, 5 }
  0x34   : > { %s2767_s30 = scalar_lea.vmem %s3133_s4, %s2127_s25  ;;  %s2784_s16 = scalar_lea.vmem %s3135_s8, %s2127_s25 }
  0x35   : > { %s2130_s19 = sshll.u32 %s2746_s28, 6  ;;  %s819_s24 = scalar_lea.vmem %s3072_s11, %s2746_s28 }
  0x36   : > { %s2798_s18 = scalar_lea.vmem %s3071_s10, %s2130_s19  ;;  %s3138_s4 = sld [smem:[#allocation30_spill]] }
  0x37   : > { %s3139_s22 = sld [smem:[#allocation35_spill]]  ;;  %p2098_p0 = scmp.ne.s32.totalorder %s3140_s3, 0 }
  0x38   : > { %s786_s15 = scalar_lea.vmem %s3131_s2, %s2127_s25  ;;  %s3137_s2 = sld [smem:[#allocation29_spill]]  ;;  %v833_v1 = vld [vmem:[%s778_s20] sm:$0xff] (!%p2098_p0)  ;;  %vm834_vm0 = vcmask (!%p2098_p0), 261120  }
  0x39   : > { %832 = sbr.rel (%p2098_p0) target bundleno = 64 (0x40), region = 96  ;;  %835 = vst.msk [vmem:[#allocation2] sm:$0xff] (!%p2098_p0), %vm834_vm0, %v833_v1 }
  0x3c   : > { %s825_s8 = scalar_lea.vmem %s3138_s4, %s2746_s28 }
  0x3d   : > { %s828_s9 = scalar_lea.vmem %s3139_s22, %s2743_s0 }
  0x3e   : > { %s822_s29 = scalar_lea.vmem %s3137_s2, %s2746_s28 }
  0x40 PF: > { %v837_v2 = vld [vmem:[%s786_s15] sm:$0xff]  ;;  %v838_v3 = vld [vmem:[%s786_s15 + $0x8] sm:$0xff]  ;;  %v839_v4 = vld [vmem:[%s786_s15 + $0x10] sm:$0xff]  ;;  %v2547_v5 = vmov 0.0|0.0   ;;  %vm2548_vm1 = vmmov 0   ;;  %v2549_v8 = vmov 0.0   ;;  %s3143_s21 = scalar_lea.vmem %s3066_s5, %s2746_s28  ;;  %s3144_s14 = scalar_lea.vmem %s3067_s6, %s2746_s28 }
  0x41   : > { %2295 = vmatprep.subr.bf16.mxu1 %v2547_v5  ;;  %v2296_v6 = vpack.c.bf16 %v838_v3, %v837_v2  ;;  %v840_v7 = vld [vmem:[%s786_s15 + $0x18] sm:$0xff]  ;;  %2190 = vmatprep.mubr.msk.f32.mxu1 %vm2548_vm1, %v2549_v8  ;;  %v2822_v10 = vld [vmem:[#allocation2] sm:$0xff]  ;;  %vm848_vm2 = vcmask 261120   ;;  %s3141_s19 = sld [smem:[#allocation24_spill]]  ;;  %s2550_s23 = smov 112   ;;  %vm925_vm3 = vcmask 130048  }
  0x42   : > { %2203 = vmatprep.subr.mxu0 %v2549_v8  ;;  %2205 = vmatprep.mubr.msk.f32.mxu0 %vm2548_vm1, %v2549_v8  ;;  %v2299_v9 = vpack.c.bf16 %v840_v7, %v839_v4  ;;  %s2551_s2 = smov 96   ;;  %s2552_s22 = smov 80   ;;  %vm1001_vm4 = vcmask 64512   ;;  %v1266_v44 = vld [vmem:[%s2767_s30] sm:$0xff]  ;;  %v1267_v45 = vld [vmem:[%s2767_s30 + $0x8] sm:$0xff]  ;;  %v1268_v47 = vld [vmem:[%s2767_s30 + $0x10] sm:$0xff] }
  0x43   : > { %2297 = vmatpush3.bf16.msra.mxu1 %v2296_v6  ;;  %s2553_s17 = smov 48   ;;  %s2554_s26 = smov 64   ;;  %v2302_v46 = vpack.c.bf16 %v1267_v45, %v1266_v44  ;;  %v1269_v48 = vld [vmem:[%s2767_s30 + $0x18] sm:$0xff]  ;;  %vm1263_vm5 = vcmask 261248   ;;  %v2108_v56 = vld [vmem:[%s3143_s21] ss:$0 sm:$0xff] }
  0x44   : > { %2298 = vmatprep.subr.bf16.mxu1 %v2547_v5  ;;  %v2305_v49 = vpack.c.bf16 %v1269_v48, %v1268_v47  ;;  %s2555_s1 = smov 16   ;;  %v1381_v3 = vld [vmem:[%s2784_s16] sm:$0xff]  ;;  %v1382_v4 = vld [vmem:[%s2784_s16 + $0x8] sm:$0xff]  ;;  %v1383_v7 = vld [vmem:[%s2784_s16 + $0x10] sm:$0xff]  ;;  %s3145_s3 = sld [smem:[#allocation26_spill]]  ;;  %vm1481_vm6 = vcmask 523264  }
  0x45   : > { %v2308_v6 = vpack.c.bf16 %v1382_v4, %v1381_v3  ;;  %s3151_s27 = sld [smem:[#allocation11_spill]] }
  0x47   : > { %2300 = vmatpush3.bf16.msra.mxu1 %v2299_v9  ;;  %s3142_s20 = scalar_lea.vmem %s3141_s19, %s2746_s28 }
  0x48   : > { %2193 = vmatprep.subr.mxu1 %v2549_v8  ;;  %v2099_v11 = vld [vmem:[%s3142_s20] ss:$0 sm:$0xff]  ;;  %s3147_s20 = sld [smem:[#allocation28_spill]] }
  0x4a   : > { %2191 = vmatmul.mubr.msk.f32.vlgmr.msra.gmra.mrb[0].mxu1 %vm848_vm2, %v2822_v10  ;;  %s3146_s4 = scalar_lea.vmem %s3145_s3, %s2746_s28 }
  0x4b   : > { %2195 = vmatprep.mubr.msk.f32.mxu1 %vm2548_vm1, %v2549_v8  ;;  %p2118_p1 = scmp.ne.s32.totalorder %s3151_s27, 1 }
  0x4c   : > { %s3152_s25 = sld [smem:[#allocation31_spill]] (!%p2118_p1)  ;;  %vm2557_vm7 = vmmov (!%p2118_p1), 0   ;;  %s3154_s13 = sld [smem:[#allocation22_spill]] (!%p2118_p1)  ;;  %vm1837_vm8 = vcmask (!%p2118_p1), 0  }
 0x11d   : > { %v918_v12 = vpop.f32.mrb[0].mxu1 }
 0x11e   : > { %v919_v13 = vadd.f32 %v2099_v11, %v918_v12  ;;  %v2192_v14 = vpop.f32.mrb[1].mxu1  ;;  %v1467_v11 = vld [vmem:[%s2798_s18 + $0x8] sm:$0xff]  ;;  %v1468_v12 = vld [vmem:[%s2798_s18 + $0x10] sm:$0xff] }
 0x11f   : > { %v1469_v14 = vld [vmem:[%s2798_s18 + $0x18] sm:$0xff] }
 0x120   : > { %1091 = vrot.lane.b32.xlu1 %v919_v13, %s2550_s23  ;;  %923 = vrot.lane.b32.xlu0 %v919_v13, %s2551_s2  ;;  %s3148_s23 = scalar_lea.vmem %s3147_s20, %s2746_s28  ;;  %s3156_s28 = sld [smem:[#allocation33_spill]] (!%p2118_p1) }
 0x124   : > { %1093 = vrot.lane.b32.xlu0 %v919_v13, %s2552_s22 }
 0x192   : > { %v924_v15 = vpop.permute.xlu0 %923  ;;  %v1092_v17 = vpop.permute.xlu1 %1091 }
 0x193   : > { %2194 = vmatpush3.xpose.msk.msra.mxu1 %vm925_vm3, %v924_v15  ;;  %v2317_v15 = vpack.c.bf16 %v1469_v14, %v1468_v12  ;;  %v1753_v14 = vld [vmem:[%s3156_s28] sm:$0xff] (!%p2118_p1) }
 0x194   : > { %2198 = vmatprep.subr.mxu1 %v2549_v8 }
 0x196   : > { %2196 = vmatmul.mubr.msk.f32.vlgmr.msra.gmra.mrb[2].mxu1 %vm925_vm3, %v919_v13  ;;  %v1094_v16 = vpop.permute.xlu0 %1093 }
 0x197   : > { %2204 = vmatpush3.xpose.msk.msra.mxu0 %vm925_vm3, %v1094_v16  ;;  %2200 = vmatprep.mubr.msk.f32.mxu1 %vm2548_vm1, %v2549_v8  ;;  %v1470_v16 = vld [vmem:[%s2798_s18 + $0x20] sm:$0xff] }
 0x198   : > { %2301 = vmatprep.subr.bf16.mxu0 %v2547_v5 }
 0x19a   : > { %2206 = vmatmul.mubr.msk.f32.vlgmr.msra.gmra.mrb[0].mxu0 %vm925_vm3, %v1092_v17  ;;  %v1471_v17 = vld [vmem:[%s2798_s18 + $0x28] sm:$0xff] }
 0x19b   : > { %2221 = vmatprep.mubr.msk.f32.mxu0 %vm2548_vm1, %v2549_v8  ;;  %2303 = vmatpush3.bf16.msra.mxu0 %v2302_v46 }
 0x19c   : > { %2304 = vmatprep.subr.bf16.mxu0 %v2547_v5 }
 0x19f   : > { %2306 = vmatpush3.bf16.msra.mxu0 %v2305_v49 }
 0x1a0   : > { %2313 = vmatprep.subr.bf16.mxu0 %v2547_v5 }
 0x269   : > { %v996_v18 = vpop.f32.mrb[2].mxu1 }
 0x26a   : > { %v1000_v19 = vmul.f32 0.25, %v996_v18  ;;  %v2197_v20 = vpop.f32.mrb[3].mxu1  ;;  %v2320_v18 = vpack.c.bf16 %v1471_v17, %v1470_v16  ;;  %v1755_v17 = vld [vmem:[%s3156_s28 + $0x10] sm:$0xff] (!%p2118_p1) }
 0x26c   : > { %v1002_v21 = vsel %vm1001_vm4, %v1000_v19, -inf }
 0x26d   : > { %v1165_v22 = vpop.f32.mrb[0].mxu0  ;;  %1003 = vmax.xlane.f32.xlu1 %v1002_v21 }
 0x26e   : > { %v1169_v23 = vmul.f32 0.25, %v1165_v22  ;;  %v2207_v24 = vpop.f32.mrb[1].mxu0 }
 0x270   : > { %v1170_v25 = vsel %vm1001_vm4, %v1169_v23, -inf }
 0x271   : > { %1171 = vmax.xlane.f32.xlu0 %v1170_v25  ;;  %v2111_v25 = vld [vmem:[%s3146_s4] ss:$0 sm:$0xff] }
 0x2fa   : > { %v1004_v26 = vpop.xlane.xlu1 %1003 }
 0x2fb   : > { %v1005_v27 = vsub.f32 %v1000_v19, %v1004_v26 }
 0x2fd   : > { %v1006_v28 = vmul.f32 1.442695, %v1005_v27  ;;  %v1472_v27 = vld [vmem:[%s2798_s18 + $0x30] sm:$0xff] }
 0x2fe   : > { %v1172_v29 = vpop.xlane.xlu0 %1171 }
 0x2ff   : > { %2435 = vpow2.f32 %v1006_v28  ;;  %v1173_v30 = vsub.f32 %v1169_v23, %v1172_v29  ;;  %v2110_v23 = vld [vmem:[%s3144_s14] ss:$0 sm:$0xff]  ;;  %v1473_v28 = vld [vmem:[%s2798_s18 + $0x38] sm:$0xff]  ;;  %s3153_s14 = smov (!%p2118_p1), %s3152_s25 }
 0x300   : > { %v2323_v29 = vpack.c.bf16 %v1473_v28, %v1472_v27  ;;  %v1594_v3 = vld [vmem:[%s3153_s14 + $0x18] sm:$0xff] (!%p2118_p1)  ;;  %v1599_v4 = vld [vmem:[%s3153_s14 + $0x40] sm:$0xff] (!%p2118_p1)  ;;  %v1757_v27 = vld [vmem:[#allocation4] sm:$0x1] (!%p2118_p1) }
 0x301   : > { %v1174_v31 = vmul.f32 1.442695, %v1173_v30  ;;  %v2112_v30 = vld [vmem:[%s3148_s23] ss:$0 sm:$0xff] }
 0x303   : > { %2437 = vpow2.f32 %v1174_v31 }
 0x309   : > { %v2436_v32 = vpop.eup %2435 }
 0x30a   : > { %v1008_v33 = vsel %vm1001_vm4, %v2436_v32, 0.0 }
 0x30b   : > { %1009 = vadd.xlane.f32.xlu0 %v1008_v33 }
 0x30d   : > { %v2438_v34 = vpop.eup %2437 }
 0x30e   : > { %v1176_v35 = vsel %vm1001_vm4, %v2438_v34, 0.0 }
 0x30f   : > { %1177 = vadd.xlane.f32.xlu1 %v1176_v35  ;;  %v2114_v35 = vld [vmem:[%s819_s24] ss:$0 sm:$0xff] }
 0x320   : > { %1183 = vrot.lane.b32.xlu1 %v919_v13, %s2553_s17 }
 0x321   : > { %1014 = vrot.lane.b32.xlu0 %v919_v13, %s2554_s26 }
 0x398   : > { %v1010_v36 = vpop.xlane.xlu0 %1009 }
 0x399   : > { %2439 = vrcp.f32 %v1010_v36 }
 0x39c   : > { %v1015_v37 = vpop.permute.xlu0 %1014  ;;  %v1178_v38 = vpop.xlane.xlu1 %1177 }
 0x39d   : > { %2441 = vrcp.f32 %v1178_v38  ;;  %2199 = vmatpush3.msra.mxu1 %v1015_v37 }
 0x39e   : > { %2208 = vmatprep.subr.mxu1 %v2549_v8 }
 0x3a0   : > { %v1184_v41 = vpop.permute.xlu1 %1183 }
 0x3a3   : > { %v2440_v39 = vpop.eup %2439 }
 0x3a4   : > { %v1012_v40 = vmul.f32 %v2440_v39, %v2436_v32 }
 0x3a6   : > { %1013 = vst.msk [vmem:[%s2812_s7] sm:$0xff] %vm1001_vm4, %v1012_v40  ;;  %2201 = vmatmul.mubr.msk.f32.vlgmr.msra.gmra.mrb[4].mxu1 %vm1001_vm4, %v1012_v40 }
 0x3a7   : > { %v2442_v42 = vpop.eup %2441  ;;  %2209 = vmatpush3.msra.mxu1 %v1184_v41  ;;  %2210 = vmatprep.mubr.msk.f32.mxu1 %vm2548_vm1, %v2549_v8 }
 0x3a8   : > { %v1180_v43 = vmul.f32 %v2442_v42, %v2438_v34  ;;  %2307 = vmatprep.subr.bf16.mxu1 %v2547_v5 }
 0x3aa   : > { %2106 = vst.msk [vmem:[%s2812_s7 + $0x8] sm:$0xff] %vm1001_vm4, %v1180_v43  ;;  %2211 = vmatmul.mubr.msk.f32.vlgmr.msra.gmra.mrb[6].mxu1 %vm1001_vm4, %v1180_v43 }
 0x3ab   : > { %2232 = vmatprep.mubr.msk.f32.mxu1 %vm2548_vm1, %v2549_v8  ;;  %2309 = vmatpush3.bf16.msra.mxu1 %v2308_v6  ;;  %v1600_v6 = vld [vmem:[%s3153_s14 + $0x48] sm:$0xff] (!%p2118_p1) }
 0x3ac   : > { %2310 = vmatprep.subr.bf16.mxu1 %v2547_v5 }
 0x479   : > { %v1086_v50 = vpop.f32.mrb[4].mxu1 }
 0x47a   : > { %1090 = vst.msk [vmem:[#allocation3] sm:$0xff] %vm925_vm3, %v1086_v50  ;;  %v2202_v51 = vpop.f32.mrb[5].mxu1  ;;  %v2116_v50 = vld [vmem:[%s822_s29] ss:$0 sm:$0xff]  ;;  %s3155_s29 = scalar_lea.vmem (!%p2118_p1), %s3154_s13, %s2743_s0 }
 0x47d   : > { %v1255_v52 = vpop.f32.mrb[6].mxu1 }
 0x47e   : > { %1260 = vrot.lane.b32.xlu1 %v1255_v52, %s2555_s1  ;;  %v2212_v53 = vpop.f32.mrb[7].mxu1  ;;  %v2117_v52 = vld [vmem:[%s825_s8] ss:$0 sm:$0xff] }
 0x4f0   : > { %v1261_v54 = vpop.permute.xlu1 %1260 }
 0x4f1   : > { %1264 = vst.msk [vmem:[#allocation3] sm:$0xff] %vm1263_vm5, %v1261_v54 }
 0x4f8   : > { %v1265_v55 = vld [vmem:[#allocation3] sm:$0xff] }
 0x4f9   : > { %2222 = vmatmul.mubr.msk.f32.vlgmr.msra.gmra.mrb[2].mxu0 %vm848_vm2, %v1265_v55  ;;  %v1595_v55 = vld [vmem:[%s3152_s25 + $0x20] sm:$0xff] (!%p2118_p1) }
 0x4fa   : > { %2251 = vmatprep.mubr.msk.f32.mxu0 %vm2548_vm1, %v2549_v8  ;;  %v1384_v8 = vld [vmem:[%s2784_s16 + $0x18] sm:$0xff] }
 0x4fb   : > { %v2311_v9 = vpack.c.bf16 %v1384_v8, %v1383_v7  ;;  %v2332_v8 = vpack.c.bf16 (!%p2118_p1), %v1600_v6, %v1599_v4 }
 0x4fd   : > { %2312 = vmatpush3.bf16.msra.mxu1 %v2311_v9 }
 0x5cc   : > { %v1346_v57 = vpop.f32.mrb[2].mxu0 }
 0x5cd   : > { %v1347_v58 = vadd.f32 %v2108_v56, %v1346_v57  ;;  %v2223_v59 = vpop.f32.mrb[3].mxu0  ;;  %v1596_v56 = vld [vmem:[%s3153_s14 + $0x28] sm:$0xff] (!%p2118_p1)  ;;  %v1597_v57 = vld [vmem:[%s3153_s14 + $0x30] sm:$0xff] (!%p2118_p1) }
 0x5ce   : > { %v2326_v59 = vpack.c.bf16 (!%p2118_p1), %v1596_v56, %v1595_v55 }
 0x5cf   : > { %v1350_v60 = vadd.f32 %v1347_v58, %v2822_v10  ;;  %v1466_v10 = vld [vmem:[%s2798_s18] sm:$0xff]  ;;  %v2556_v58 = vmov (!%p2118_p1), 0.0|0.0   ;;  %s3157_s18 = sld [smem:[#allocation32_spill]] (!%p2118_p1) }
 0x5d0   : > { %v2314_v13 = vpack.c.bf16 %v1467_v11, %v1466_v10  ;;  %2337 = vmatprep.subr.bf16.mxu1 (!%p2118_p1), %v2556_v58  ;;  %v1601_v10 = vld [vmem:[%s3153_s14 + $0x50] sm:$0xff] (!%p2118_p1)  ;;  %v1602_v11 = vld [vmem:[%s3153_s14 + $0x58] sm:$0xff] (!%p2118_p1) }
 0x5d1   : > { %v1353_v61 = vsel %vm848_vm2, %v1350_v60, 0.0  ;;  %v2335_v12 = vpack.c.bf16 (!%p2118_p1), %v1602_v11, %v1601_v10 }
 0x5d2   : > { %1354 = vadd.xlane.f32.xlu0 %v1353_v61  ;;  %2315 = vmatpush3.bf16.msra.mxu0 %v2314_v13  ;;  %v1591_v61 = vld [vmem:[%s3153_s14] sm:$0xff] (!%p2118_p1) }
 0x5d3   : > { %2316 = vmatprep.subr.bf16.mxu0 %v2547_v5  ;;  %v1590_v13 = vld [vmem:[%s3155_s29] sm:$0x1] (!%p2118_p1) }
 0x5d6   : > { %2318 = vmatpush3.bf16.msra.mxu0 %v2317_v15  ;;  %v1754_v15 = vld [vmem:[%s3156_s28 + $0x8] sm:$0xff] (!%p2118_p1) }
 0x5d7   : > { %2319 = vmatprep.subr.bf16.mxu0 %v2547_v5  ;;  %v2344_v16 = vpack.c.bf16 (!%p2118_p1), %v1754_v15, %v1753_v14 }
 0x5da   : > { %2321 = vmatpush3.bf16.msra.mxu0 %v2320_v18  ;;  %v1756_v18 = vld [vmem:[%s3156_s28 + $0x18] sm:$0xff] (!%p2118_p1) }
 0x5db   : > { %2322 = vmatprep.subr.bf16.mxu0 %v2547_v5 }
 0x5de   : > { %2324 = vmatpush3.bf16.msra.mxu0 %v2323_v29 }
 0x5df   : > { %2325 = vmatprep.subr.bf16.mxu0 (!%p2118_p1), %v2556_v58 }
 0x65f   : > { %v1355_v62 = vpop.xlane.xlu0 %1354 }
 0x660   : > { %v1357_v63 = vmul.f32 0.03125, %v1355_v62  ;;  %v1592_v62 = vld [vmem:[%s3153_s14 + $0x8] sm:$0xff] (!%p2118_p1) }
 0x662   : > { %v1358_v0 = vsub.f32 %v1350_v60, %v1357_v63  ;;  %v1598_v60 = vld [vmem:[%s3153_s14 + $0x38] sm:$0xff] (!%p2118_p1)  ;;  %v2338_v63 = vpack.c.bf16 (!%p2118_p1), %v1592_v62, %v1591_v61 }
 0x664   : > { %v1359_v1 = vmul.f32 %v1358_v0, %v1358_v0 }
 0x666   : > { %v1360_v2 = vsel %vm848_vm2, %v1359_v1, 0.0  ;;  %v2558_v1 = vmov (!%p2118_p1), 0.0  }
 0x667   : > { %1361 = vadd.xlane.f32.xlu1 %v1360_v2  ;;  %v2329_v2 = vpack.c.bf16 (!%p2118_p1), %v1598_v60, %v1597_v57 }
 0x6f4   : > { %v1362_v19 = vpop.xlane.xlu1 %1361 }
 0x6f5   : > { %v1363_v20 = vmul.f32 0.03125, %v1362_v19  ;;  %v2347_v19 = vpack.c.bf16 (!%p2118_p1), %v1756_v18, %v1755_v17 }
 0x6f7   : > { %v1364_v21 = vadd.f32 1e-05, %v1363_v20 }
 0x6f9   : > { %2443 = vrsqrt.f32 %v1364_v21 }
 0x703   : > { %v2444_v22 = vpop.eup %2443 }
 0x704   : > { %v1366_v24 = vmul.f32 %v2444_v22, %v1358_v0  ;;  %v1593_v0 = vld [vmem:[%s3153_s14 + $0x10] sm:$0xff] (!%p2118_p1) }
 0x705   : > { %v2341_v7 = vpack.c.bf16 (!%p2118_p1), %v1594_v3, %v1593_v0 }
 0x706   : > { %v1373_v26 = vmul.f32 %v2110_v23, %v1366_v24  ;;  %v1750_v23 = vld [vmem:[%s3157_s18] sm:$0x1] (!%p2118_p1) }
 0x708   : > { %v1380_v5 = vadd.f32 %v2111_v25, %v1373_v26 }
 0x70a   : > { %2233 = vmatmul.mubr.msk.f32.vlgmr.msra.gmra.mrb[8].mxu1 %vm848_vm2, %v1380_v5 }
 0x70b   : > { %2281 = vmatprep.mubr.msk.f32.mxu1 (!%p2118_p1), %vm2557_vm7, %v2558_v1  ;;  %2339 = vmatpush3.bf16.msra.mxu1 (!%p2118_p1), %v2338_v63 }
 0x70c   : > { %2340 = vmatprep.subr.bf16.mxu1 (!%p2118_p1), %v2556_v58 }
 0x70f   : > { %2342 = vmatpush3.bf16.msra.mxu1 (!%p2118_p1), %v2341_v7 }
 0x710   : > { %2343 = vmatprep.subr.bf16.mxu1 (!%p2118_p1), %v2556_v58 }
 0x7dd   : > { %v1461_v31 = vpop.f32.mrb[8].mxu1 }
 0x7de   : > { %v1462_v32 = vadd.f32 %v2112_v30, %v1461_v31  ;;  %v2234_v33 = vpop.f32.mrb[9].mxu1 }
 0x7e0   : > { %v1465_v34 = vmax.f32 %v1462_v32, 0.0 }
 0x7e2   : > { %2252 = vmatmul.mubr.msk.f32.vlgmr.msra.gmra.mrb[4].mxu0 %vm1481_vm6, %v1465_v34 }
 0x7e3   : > { %2270 = vmatprep.mubr.msk.f32.mxu0 (!%p2118_p1), %vm2557_vm7, %v2558_v1  ;;  %2327 = vmatpush3.bf16.msra.mxu0 (!%p2118_p1), %v2326_v59 }
 0x7e4   : > { %2328 = vmatprep.subr.bf16.mxu0 (!%p2118_p1), %v2556_v58 }
 0x7e7   : > { %2330 = vmatpush3.bf16.msra.mxu0 (!%p2118_p1), %v2329_v2 }
 0x7e8   : > { %2331 = vmatprep.subr.bf16.mxu0 (!%p2118_p1), %v2556_v58 }
 0x7eb   : > { %2333 = vmatpush3.bf16.msra.mxu0 (!%p2118_p1), %v2332_v8 }
 0x7ec   : > { %2334 = vmatprep.subr.bf16.mxu0 (!%p2118_p1), %v2556_v58 }
 0x7ef   : > { %2336 = vmatpush3.bf16.msra.mxu0 (!%p2118_p1), %v2335_v12 }
 0x7f2   : > { %2271 = vmatmul.mubr.msk.f32.vlgmr.msra.gmra.mrb[0].mxu0 (!%p2118_p1), %vm1481_vm6, %v1590_v13 }
 0x8b5   : > { %v1551_v36 = vpop.f32.mrb[4].mxu0 }
 0x8b6   : > { %v1552_v37 = vadd.f32 %v2114_v35, %v1551_v36  ;;  %v2253_v38 = vpop.f32.mrb[5].mxu0 }
 0x8b8   : > { %v1555_v39 = vadd.f32 %v1552_v37, %v1380_v5 }
 0x8ba   : > { %v1558_v40 = vsel %vm848_vm2, %v1555_v39, 0.0 }
 0x8bb   : > { %1559 = vadd.xlane.f32.xlu0 %v1558_v40 }
 0x8c5   : > { %v1672_v22 = vpop.f32.mrb[0].mxu0 (!%p2118_p1) }
 0x8c6   : > { %v2272_v25 = vpop.f32.mrb[1].mxu0 (!%p2118_p1) }
 0x948   : > { %v1560_v41 = vpop.xlane.xlu0 %1559 }
 0x949   : > { %v1561_v42 = vmul.f32 0.03125, %v1560_v41 }
 0x94b   : > { %v1562_v43 = vsub.f32 %v1555_v39, %v1561_v42 }
 0x94d   : > { %v1563_v44 = vmul.f32 %v1562_v43, %v1562_v43 }
 0x94f   : > { %v1564_v45 = vsel %vm848_vm2, %v1563_v44, 0.0 }
 0x950   : > { %1565 = vadd.xlane.f32.xlu0 %v1564_v45 }
 0x9dd   : > { %v1566_v46 = vpop.xlane.xlu0 %1565 }
 0x9de   : > { %v1567_v47 = vmul.f32 0.03125, %v1566_v46 }
 0x9e0   : > { %v1568_v48 = vadd.f32 1e-05, %v1567_v47 }
 0x9e2   : > { %2445 = vrsqrt.f32 %v1568_v48 }
 0x9ec   : > { %v2446_v49 = vpop.eup %2445 }
 0x9ed   : > { %v1570_v51 = vmul.f32 %v2446_v49, %v1562_v43  ;;  %1589 = sbr.rel (%p2118_p1) target bundleno = 3010 (0xbc2), region = 100 }
 0x9ef   : > { %v1577_v53 = vmul.f32 %v2116_v50, %v1570_v51 }
 0x9f1   : > { %v1584_v54 = vadd.f32 %v2117_v52, %v1577_v53 }
 0x9f3   : > { %1585 = vst.msk [vmem:[#allocation2] sm:$0xff] %vm848_vm2, %v1584_v54  ;;  %v1677_v9 = vrot.slane (!%p2118_p1), %v1584_v54, 7 }
 0x9f5   : > { %2282 = vmatmul.mubr.msk.f32.vlgmr.msra.gmra.mrb[0].mxu1 %vm848_vm2, %v1677_v9 }
 0x9f6   : > { %2292 = vmatprep.mubr.msk.f32.mxu1 %vm2557_vm7, %v2558_v1  ;;  %2345 = vmatpush3.bf16.msra.mxu1 %v2344_v16 }
 0x9f7   : > { %2346 = vmatprep.subr.bf16.mxu1 %v2556_v58 }
 0x9fa   : > { %2348 = vmatpush3.bf16.msra.mxu1 %v2347_v19 }
 0xac8   : > { %v1746_v20 = vpop.f32.mrb[0].mxu1 }
 0xac9   : > { %v2283_v21 = vpop.f32.mrb[1].mxu1  ;;  %v1747_v24 = vadd.f32 %v1746_v20, %v1672_v22 }
 0xacb   : > { %v1751_v26 = vadd.f32 %v1750_v23, %v1747_v24 }
 0xacd   : > { %v1752_v5 = vmax.f32 %v1751_v26, 0.0 }
 0xacf   : > { %2293 = vmatmul.mubr.msk.f32.vlgmr.msra.gmra.mrb[2].mxu1 %vm848_vm2, %v1752_v5 }
 0xba2   : > { %v1827_v28 = vpop.f32.mrb[2].mxu1 }
 0xba3   : > { %v1828_v29 = vadd.f32 %v1827_v28, %v1757_v27  ;;  %v2294_v30 = vpop.f32.mrb[3].mxu1 }
 0xba5   : > { %v1831_v31 = vsub.f32 0.0, %v1828_v29 }
 0xba7   : > { %v1832_v32 = vmul.f32 1.442695, %v1831_v31 }
 0xba9   : > { %2447 = vpow2.f32 %v1832_v32 }
 0xbb3   : > { %v2448_v33 = vpop.eup %2447 }
 0xbb4   : > { %v1834_v34 = vadd.f32 1.0, %v2448_v33 }
 0xbb6   : > { %2449 = vrcp.f32 %v1834_v34 }
 0xbc0   : > { %v2450_v35 = vpop.eup %2449 }
 0xbc1   : > { %1838 = vst.msk [vmem:[%s828_s9] sm:$0x1] %vm1837_vm8, %v2450_v35 }
 0xbc2 PF: > { %s3159_s30 = sld [smem:[#allocation11_spill]]  ;;  %s3160_s27 = sld [smem:[#allocation12_spill]] }
 0xbc3   : > { %s3161_s21 = sld [smem:[#allocation9_spill]]  ;;  %s1857_s13 = sshll.u32 %s2812_s7, 4  ;;  %s3000_s13 = int_to_ptr.vmem [resolvable:$true] %s1857_s13 }
 0xbc4   : > { %s3163_s4 = sld [smem:[#allocation34_spill]]  ;;  %s2451_s19 = scalar_lea.vmem %s3000_s13, 256 }
 0xbc5   : > { %p2452_p2 = scmp.ne.s32.totalorder %s3000_s13, %s2451_s19  ;;  %s2559_s7 = smov [#allocation5]  }
 0xbc6   : > { %s2455_s20 = sshll.u32 %s2559_s7, 4  ;;  %s2456_s20 = int_to_ptr.vmem [resolvable:$false] %s2455_s20 }
 0xbc7   : > { %p2453_p4 = pnand %p2452_p2, %p2717_p3  ;;  %s2457_s23 = scalar_lea.vmem %s2456_s20, 512 }
 0xbc8   : > { %s2123_s25 = sshll.u32 %s3159_s30, 2  ;;  %p2458_p6 = scmp.lt.s32.totalorder %s3000_s13, %s2456_s20 }
 0xbc9   : > { %s1854_s12 = sadd.s32 %s3160_s27, %s2123_s25  ;;  %s3164_s9 = sand.u32 1, %s3161_s21  }
 0xbca   : > { %s2124_s29 = sshll.u32 %s1854_s12, 7  ;;  %s3009_s15 = scalar_lea.sflag [#allocation6], %s3164_s9 }
 0xbcb   : > { %s3005_s0 = scalar_lea.hbm %s3163_s4, %s2124_s29  ;;  %p2454_p5 = pneg %p2453_p4 }
 0xbcc   : > { %p2459_p7 = scmp.lt.s32.totalorder %s2457_s23, %s2451_s19 }
 0xbce   : > { %p2460_p9 = por %p2459_p7, %p2458_p6 }
 0xbd0   : > { %p2461_p10 = pnand %p2460_p9, %p2454_p5 }
 0xbd2   : > { %2464 = shalt.err (!%p2461_p10)
}
 0xbd3   : > { %s2465_s2 = scalar_lea.hbm %s3005_s0, 256  ;;  %s2469_s18 = scalar_lea.hbm %s3163_s4, 1024 }
 0xbd4   : > { %p2466_p11 = scmp.ne.s32.totalorder %s3005_s0, %s2465_s2  ;;  %p2470_p0 = scmp.lt.u32.totalorder %s3005_s0, %s3163_s4 }
 0xbd5   : > { %p2471_p1 = scmp.lt.u32.totalorder %s2469_s18, %s2465_s2  ;;  %p2473_p4 = scmp.lt.u32.totalorder %s2465_s2, %s3005_s0 }
 0xbd6   : > { %p2467_p12 = pnand %p2466_p11, %p2717_p3 }
 0xbd7   : > { %p2472_p2 = por %p2471_p1, %p2470_p0 }
 0xbd8   : > { %p2468_p13 = pneg %p2467_p12 }
 0xbd9   : > { %p2474_p5 = por %p2473_p4, %p2472_p2 }
 0xbdb   : > { %p2475_p6 = pnand %p2474_p5, %p2468_p13 }
 0xbdd   : > { %2478 = shalt.err (!%p2475_p6)
}
 0xbde   : > { %s2560_s1 = smov 128   ;;  %s2561_s30 = smov 256  }
 0xbdf   : > { %s2562_s27 = smov 8  }
 0xbe0   : > { %2349 = dma.vmem_to_hbm [thread:$0]  (%p2717_p3), %s3000_s13, 256, %s3005_s0, %s3009_s15, %s2560_s1, %s2561_s30, %s2562_s27  }
 0xbe1 PF: > { %s3165_s21 = sld [smem:[#allocation15_spill]]  ;;  %s3166_s25 = sld [smem:[#allocation8_spill]] }
 0xbe7   : > { %p2355_p7 = scmp.ge.s32.totalorder %s3165_s21, 2  ;;  %s1875_s29 = sand.u32 1, %s3166_s25  }
 0xbe8   : > { %s1876_s3 = scalar_lea.sflag [#allocation6], %s1875_s29 }
 0xbe9   : > { %p2352_p9 = pnand %p2355_p7, %p2726_p8 }
 0xbeb   : > { %2512 = dma.done.wait (!%p2352_p9), %s1876_s3, 256  }
 0xbec   : > { %2514 = vsyncadd (!%p2352_p9), %s1876_s3, 4294967040  ;;  %s35_s25 = sadd.s32 1, %s3165_s21   ;;  %s3168_s20 = sld [smem:[#allocation9_spill]] }
 0xbed   : > { %p32_p10 = scmp.ge.s32.totalorder %s35_s25, 6   ;;  %s3169_s21 = sld [smem:[#allocation10_spill]] }
 0xbee   : > { %s3170_s1 = sld [smem:[#allocation20_spill]]  ;;  %s3171_s22 = sld [smem:[#allocation13_spill]] }
 0xbef   : > { %s3172_s2 = sld [smem:[#allocation14_spill]]  ;;  %s3173_s23 = sld [smem:[#allocation16_spill]] }
 0xbf0   : > { %s3174_s24 = sld [smem:[#allocation18_spill]]  ;;  %34 = sbr.rel (!%p32_p10) target bundleno = 21 (0x15), region = 187 }
 0xbf7   :  { %1887 = vsyncpa [#allocation6], 1 }
 0xbf8   :  { %1889 = vsyncpa [#allocation6 + $0x1], 1 }

</bundles_post_ra>
